<compile_context>
chip_gen: v7x
topology: tpu7x:2x2x1
jax: 0.10.0
libtpu: 0.0.40
codegen_flags: <defaults>
</compile_context>

<pallas_src>
import functools
import math

import jax
import jax.numpy as jnp
from jax.experimental import pallas as pl
from jax.experimental.pallas import tpu as pltpu


_TILE = 512   # GEMM tile cap: bf16 weights keep the double-buffered working set ~7 MiB


def _round_up(x, m):
    return (x + m - 1) // m * m


# ---------------------------------------------------------------------------
# Kernel 1: tiled linear  y = relu?(x @ W + b [+ residual])
# ---------------------------------------------------------------------------
def _linear_kernel(x_ref, w_ref, b_ref, *rest, apply_relu, has_residual):
    if has_residual:
        r_ref, o_ref = rest
    else:
        (o_ref,) = rest

    k = pl.program_id(2)

    @pl.when(k == 0)
    def _():
        o_ref[...] = jnp.zeros_like(o_ref)

    # bf16 operands on the MXU, f32 accumulation directly into the resident output block.
    o_ref[...] += jnp.dot(x_ref[...].astype(jnp.bfloat16), w_ref[...],
                          preferred_element_type=jnp.float32)

    @pl.when(k == pl.num_programs(2) - 1)
    def _():
        y = o_ref[...] + b_ref[...]
        if has_residual:
            y = y + r_ref[...]
        if apply_relu:
            y = jnp.maximum(y, 0.0)
        o_ref[...] = y


def pallas_linear(x, lin, n_out, *, apply_relu=False, residual=None):
    """y = relu?(x @ W + b [+ residual]).

    lin["w"]: (Kp, Np) bf16, pre-padded/pre-cast at init.  lin["b"]: (1, Np) f32.
    n_out: static logical output width N.  K is taken from x.shape[-1].
    """
    wp, bp = lin["w"], lin["b"]
    K = x.shape[-1]
    N = n_out
    Kp, Np = wp.shape
    lead = x.shape[:-1]
    x2 = x.reshape(-1, K)
    M = x2.shape[0]

    tk = min(_TILE, _round_up(K, 128))
    tn = min(_TILE, _round_up(N, 128))
    assert Kp % tk == 0 and Np % tn == 0, (Kp, tk, Np, tn)

    tm = min(_TILE, _round_up(M, 8))
    Mp = _round_up(M, tm)
    # v7x has two TensorCores: make sure at least one "parallel" grid axis has >= 2
    # steps whenever the problem allows it (no effect on single-TC v5e/v6e).
    if Mp // tm == 1 and Np // tn == 1 and Mp > 8:
        tm = _round_up(Mp // 2, 8)
        Mp = _round_up(M, tm)

    x2p = jnp.pad(x2, ((0, Mp - M), (0, Kp - K)))

    operands = [x2p, wp, bp]
    in_specs = [
        pl.BlockSpec((tm, tk), lambda i, j, k: (i, k)),
        pl.BlockSpec((tk, tn), lambda i, j, k: (k, j)),
        pl.BlockSpec((1, tn), lambda i, j, k: (0, j)),
    ]
    has_residual = residual is not None
    if has_residual:
        r2p = jnp.pad(residual.reshape(-1, N), ((0, Mp - M), (0, Np - N)))
        operands.append(r2p)
        in_specs.append(pl.BlockSpec((tm, tn), lambda i, j, k: (i, j)))

    bytes_accessed = (Mp * Kp * 4 + Kp * Np * 2 + Np * 4 + Mp * Np * 4
                      + (Mp * Np * 4 if has_residual else 0))
    cost = pl.CostEstimate(flops=2 * M * K * N, transcendentals=0,
                           bytes_accessed=bytes_accessed)

    kernel = functools.partial(_linear_kernel, apply_relu=apply_relu,
                               has_residual=has_residual)
    out = pl.pallas_call(
        kernel,
        out_shape=jax.ShapeDtypeStruct((Mp, Np), jnp.float32),
        grid_spec=pltpu.PrefetchScalarGridSpec(
            num_scalar_prefetch=0,
            grid=(Mp // tm, Np // tn, Kp // tk),
            in_specs=in_specs,
            out_specs=pl.BlockSpec((tm, tn), lambda i, j, k: (i, j)),
        ),
        compiler_params=pltpu.CompilerParams(
            dimension_semantics=("parallel", "parallel", "arbitrary")),
        cost_estimate=cost,
    )(*operands)

    return out[:M, :N].reshape(*lead, N)


# ---------------------------------------------------------------------------
# Kernel 2: LayerNorm over the last dim (one-pass sum/sumsq statistics)
# ---------------------------------------------------------------------------
def _layernorm_kernel(x_ref, g_ref, b_ref, o_ref, *, eps):
    x = x_ref[...].astype(jnp.float32)
    d = x.shape[-1]
    s = jnp.sum(x, axis=-1, keepdims=True)
    ss = jnp.sum(x * x, axis=-1, keepdims=True)
    mean = s * (1.0 / d)
    var = jnp.maximum(ss * (1.0 / d) - mean * mean, 0.0)
    inv = jax.lax.rsqrt(var + eps)
    y = (x - mean) * inv * g_ref[...] + b_ref[...]
    o_ref[...] = y.astype(o_ref.dtype)


def pallas_layernorm(x, gamma, beta, *, eps=1e-5, tm=256):
    # TODO(synk): for very large D on v5e (16 MiB default scoped VMEM) shrink tm or
    # raise vmem_limit_bytes.
    orig_shape = x.shape
    D = orig_shape[-1]
    x2 = x.reshape(-1, D)
    M = x2.shape[0]
    tm = min(tm, _round_up(M, 8))
    Mp = _round_up(M, tm)
    if Mp // tm == 1 and Mp > 8:       # give v7x's second TensorCore some rows
        tm = _round_up(Mp // 2, 8)
        Mp = _round_up(M, tm)
    x2p = jnp.pad(x2, ((0, Mp - M), (0, 0)))
    g2 = gamma.reshape(1, D).astype(jnp.float32)
    b2 = beta.reshape(1, D).astype(jnp.float32)

    kernel = functools.partial(_layernorm_kernel, eps=eps)
    out = pl.pallas_call(
        kernel,
        out_shape=jax.ShapeDtypeStruct((Mp, D), x.dtype),
        grid=(Mp // tm,),
        in_specs=[
            pl.BlockSpec((tm, D), lambda i: (i, 0)),
            pl.BlockSpec((1, D), lambda i: (0, 0)),
            pl.BlockSpec((1, D), lambda i: (0, 0)),
        ],
        out_specs=pl.BlockSpec((tm, D), lambda i: (i, 0)),
        compiler_params=pltpu.CompilerParams(dimension_semantics=("parallel",)),
    )(x2p, g2, b2)
    return out[:M].reshape(orig_shape)


# ---------------------------------------------------------------------------
# Kernel 3: fused multi-head attention, gridded over batch.
# Heads are sliced in-kernel out of the packed (B, S, D*) projection outputs (no wrapper
# transposes), the causal mask is generated with broadcasted_iota, score/context matmuls
# run in bf16 with f32 softmax math, and the output store is lane-dense over D.
# (Small demo sequences -> full-sequence blocks; long sequences would use a flash-style
#  K-tiled online-softmax variant, especially on v7x with 64 MiB VMEM.)
# ---------------------------------------------------------------------------
def _mha_kernel(*refs, n_heads, dh, q_off, k_off, v_off, scale, causal, fused):
    if fused:
        q_ref, o_ref = refs
        kv_ref = q_ref
    else:
        q_ref, kv_ref, o_ref = refs

    q_all = q_ref[0]            # (Sq, Dq)  f32
    kv_all = kv_ref[0]          # (Sk, Dkv) f32
    sq = q_all.shape[0]
    sk = kv_all.shape[0]

    if causal:
        row = jax.lax.broadcasted_iota(jnp.int32, (sq, sk), 0)
        col = jax.lax.broadcasted_iota(jnp.int32, (sq, sk), 1)
        keep = row >= col

    ctxs = []
    for h in range(n_heads):
        qh = q_all[:, q_off + h * dh: q_off + (h + 1) * dh].astype(jnp.bfloat16)
        kh = kv_all[:, k_off + h * dh: k_off + (h + 1) * dh].astype(jnp.bfloat16)
        vh = kv_all[:, v_off + h * dh: v_off + (h + 1) * dh].astype(jnp.bfloat16)
        # s = q @ k^T  (contract the head dim of both operands)
        s = jax.lax.dot_general(qh, kh, (((1,), (1,)), ((), ())),
                                preferred_element_type=jnp.float32) * scale
        if causal:
            s = jnp.where(keep, s, -1e9)        # mask stays in the f32 score path
        m = jnp.max(s, axis=-1, keepdims=True)
        p = jnp.exp(s - m)
        l = jnp.sum(p, axis=-1, keepdims=True)
        ctx = jnp.dot(p.astype(jnp.bfloat16), vh,
                      preferred_element_type=jnp.float32)
        ctxs.append(ctx * pl.reciprocal(l, approx=True))

    out = ctxs[0] if n_heads == 1 else jnp.concatenate(ctxs, axis=-1)
    o_ref[0] = out.astype(o_ref.dtype)


def pallas_mha(q_src, kv_src, out_d, *, n_heads, dh, q_off, k_off, v_off, causal):
    """q_src: (B, Sq, Dq).  kv_src: (B, Sk, Dkv) or None (packed QKV in q_src).
    q/k/v heads live at element offsets q_off/k_off/v_off in the last dim."""
    B, Sq, Dq = q_src.shape
    fused = kv_src is None
    scale = 1.0 / math.sqrt(dh)

    in_specs = [pl.BlockSpec((1, Sq, Dq), lambda b: (b, 0, 0))]
    operands = [q_src]
    if not fused:
        Sk, Dkv = kv_src.shape[1], kv_src.shape[2]
        in_specs.append(pl.BlockSpec((1, Sk, Dkv), lambda b: (b, 0, 0)))
        operands.append(kv_src)

    kernel = functools.partial(_mha_kernel, n_heads=n_heads, dh=dh, q_off=q_off,
                               k_off=k_off, v_off=v_off, scale=scale,
                               causal=causal, fused=fused)
    return pl.pallas_call(
        kernel,
        out_shape=jax.ShapeDtypeStruct((B, Sq, out_d), q_src.dtype),
        grid=(B,),
        in_specs=in_specs,
        out_specs=pl.BlockSpec((1, Sq, out_d), lambda b: (b, 0, 0)),
        compiler_params=pltpu.CompilerParams(dimension_semantics=("parallel",)),
    )(*operands)


# ---------------------------------------------------------------------------
# Module composition (matches the PyTorch forward passes)
# ---------------------------------------------------------------------------
def _mha_self(p, x_norm, residual, *, n_heads, d_model, causal):
    dh = d_model // n_heads
    qkv = pallas_linear(x_norm, p["qkv"], 3 * d_model)          # fused Q|K|V projection
    ctx = pallas_mha(qkv, None, d_model, n_heads=n_heads, dh=dh,
                     q_off=0, k_off=d_model, v_off=2 * d_model, causal=causal)
    return pallas_linear(ctx, p["o"], d_model, residual=residual)   # residual fused


def _mha_cross(p, q_norm, mem_norm, residual, *, n_heads, d_model):
    dh = d_model // n_heads
    q = pallas_linear(q_norm, p["q"], d_model)
    kv = pallas_linear(mem_norm, p["kv"], 2 * d_model)           # fused K|V projection
    ctx = pallas_mha(q, kv, d_model, n_heads=n_heads, dh=dh,
                     q_off=0, k_off=0, v_off=d_model, causal=False)
    return pallas_linear(ctx, p["o"], d_model, residual=residual)   # residual fused


def transformer_decoder_block(p, dec, enc, *, n_heads, d_model, d_filter, mask_future):
    norm_dec = pallas_layernorm(dec, p["self_norm_g"], p["self_norm_b"])
    res1 = _mha_self(p["self_attn"], norm_dec, dec,
                     n_heads=n_heads, d_model=d_model, causal=mask_future)
    norm_tgt = pallas_layernorm(res1, p["cross_norm_t_g"], p["cross_norm_t_b"])
    norm_enc = pallas_layernorm(enc, p["cross_norm_s_g"], p["cross_norm_s_b"])
    res2 = _mha_cross(p["cross_attn"], norm_tgt, norm_enc, res1,
                      n_heads=n_heads, d_model=d_model)
    # TransformerFeedForward: LN -> Linear -> ReLU -> Linear -> dropout(0)=id -> +residual
    ff_in = pallas_layernorm(res2, p["ff_norm_g"], p["ff_norm_b"])
    h = pallas_linear(ff_in, p["ff1"], d_filter, apply_relu=True)
    return pallas_linear(h, p["ff2"], d_model, residual=res2)       # residual fused


def shift_target_sequence_right(target_sequence):
    pad_val = 0 if jnp.issubdtype(target_sequence.dtype, jnp.integer) else 1e-10
    pad = jnp.full_like(target_sequence[:, :1], pad_val)
    return jnp.concatenate([pad, target_sequence[:, :-1]], axis=1)


def transformer_decoder_fwd(dev_params, target_input, encoder_output, *, n_heads,
                            d_model, d_filter, output_size,
                            mask_future=False, shift_right=False):
    # TODO(synk): encoder/decoder padding masks (get_cross_attention_mask with non-None
    # masks) are not implemented; only the None / causal-future mask cases are covered.
    if shift_right:
        target_input = shift_target_sequence_right(target_input)
    # Injected embedding_layer / output_layer modules are modeled as dense projections.
    x = pallas_linear(target_input, dev_params["embed"], d_model)
    for blk in dev_params["blocks"]:
        x = transformer_decoder_block(blk, x, encoder_output, n_heads=n_heads,
                                      d_model=d_model, d_filter=d_filter,
                                      mask_future=mask_future)
    return pallas_linear(x, dev_params["out"], output_size)


# ---------------------------------------------------------------------------
# Parameter init (f32 "math" params) and one-time device preparation
# (fuse QKV/KV, pad to tile-aligned shapes, cast weights to bf16)
# ---------------------------------------------------------------------------
def _init_linear(key, fan_in, fan_out, dtype=jnp.float32):
    kw, kb = jax.random.split(key)
    bound = math.sqrt(6.0 / (fan_in + fan_out))          # xavier_uniform_
    w = jax.random.uniform(kw, (fan_in, fan_out), dtype, -bound, bound)
    bb = 1.0 / math.sqrt(fan_in)
    b = jax.random.uniform(kb, (fan_out,), dtype, -bb, bb)
    return w, b


def init_mha_params(key, d_model, dtype=jnp.float32):
    p = {}
    for name, k in zip(("q", "k", "v", "o"), jax.random.split(key, 4)):
        w, b = _init_linear(k, d_model, d_model, dtype)
        p["w" + name], p["b" + name] = w, b
    return p


def init_block_params(key, d_model, d_filter, dtype=jnp.float32):
    k_sa, k_ca, k_f1, k_f2 = jax.random.split(key, 4)
    ff_w1, ff_b1 = _init_linear(k_f1, d_model, d_filter, dtype)
    ff_w2, ff_b2 = _init_linear(k_f2, d_filter, d_model, dtype)
    ones, zeros = jnp.ones((d_model,), dtype), jnp.zeros((d_model,), dtype)
    return {
        "self_norm_g": ones, "self_norm_b": zeros,
        "cross_norm_t_g": ones, "cross_norm_t_b": zeros,
        "cross_norm_s_g": ones, "cross_norm_s_b": zeros,
        "ff_norm_g": ones, "ff_norm_b": zeros,
        "self_attn": init_mha_params(k_sa, d_model, dtype),
        "cross_attn": init_mha_params(k_ca, d_model, dtype),
        "ff_w1": ff_w1, "ff_b1": ff_b1,
        "ff_w2": ff_w2, "ff_b2": ff_b2,
    }


def init_decoder_params(key, target_ndims, d_model, d_filter, n_layers,
                        output_size, dtype=jnp.float32):
    k_emb, k_out, k_blocks = jax.random.split(key, 3)
    embed_w, embed_b = _init_linear(k_emb, target_ndims, d_model, dtype)
    out_w, out_b = _init_linear(k_out, d_model, output_size, dtype)
    return {
        "embed_w": embed_w, "embed_b": embed_b,
        "blocks": [init_block_params(k, d_model, d_filter, dtype)
                   for k in jax.random.split(k_blocks, n_layers)],
        "out_w": out_w, "out_b": out_b,
    }


def _prep_linear(w, b):
    """Pad (K,N)->(Kp,Np), cast weight to bf16, bias stays f32 (1,Np)."""
    K, N = w.shape
    tk = min(_TILE, _round_up(K, 128))
    tn = min(_TILE, _round_up(N, 128))
    Kp, Np = _round_up(K, tk), _round_up(N, tn)
    wp = jnp.pad(w, ((0, Kp - K), (0, Np - N))).astype(jnp.bfloat16)
    bp = jnp.pad(b, (0, Np - N)).astype(jnp.float32).reshape(1, Np)
    return {"w": wp, "b": bp}


def prepare_decoder_params(mp):
    """One-time conversion of the f32 math params into padded/bf16 device params."""
    def prep_block(b):
        sa, ca = b["self_attn"], b["cross_attn"]
        return {
            "self_norm_g": b["self_norm_g"], "self_norm_b": b["self_norm_b"],
            "cross_norm_t_g": b["cross_norm_t_g"], "cross_norm_t_b": b["cross_norm_t_b"],
            "cross_norm_s_g": b["cross_norm_s_g"], "cross_norm_s_b": b["cross_norm_s_b"],
            "ff_norm_g": b["ff_norm_g"], "ff_norm_b": b["ff_norm_b"],
            "self_attn": {
                "qkv": _prep_linear(
                    jnp.concatenate([sa["wq"], sa["wk"], sa["wv"]], axis=1),
                    jnp.concatenate([sa["bq"], sa["bk"], sa["bv"]])),
                "o": _prep_linear(sa["wo"], sa["bo"]),
            },
            "cross_attn": {
                "q": _prep_linear(ca["wq"], ca["bq"]),
                "kv": _prep_linear(
                    jnp.concatenate([ca["wk"], ca["wv"]], axis=1),
                    jnp.concatenate([ca["bk"], ca["bv"]])),
                "o": _prep_linear(ca["wo"], ca["bo"]),
            },
            "ff1": _prep_linear(b["ff_w1"], b["ff_b1"]),
            "ff2": _prep_linear(b["ff_w2"], b["ff_b2"]),
        }
    return {
        "embed": _prep_linear(mp["embed_w"], mp["embed_b"]),
        "blocks": [prep_block(b) for b in mp["blocks"]],
        "out": _prep_linear(mp["out_w"], mp["out_b"]),
    }


# ---------------------------------------------------------------------------
# Pure-JAX reference (f32, same math params) for the correctness check
# ---------------------------------------------------------------------------
def _causal_bias(seq_len):
    idx = jnp.arange(seq_len)
    allowed = idx[:, None] >= idx[None, :]
    return jnp.where(allowed, 0.0, -1e9).astype(jnp.float32)[None]   # (1, S, S)


def _ref_layernorm(x, g, b, eps=1e-5):
    x = x.astype(jnp.float32)
    mu = jnp.mean(x, -1, keepdims=True)
    var = jnp.mean(jnp.square(x - mu), -1, keepdims=True)
    return (x - mu) * jax.lax.rsqrt(var + eps) * g + b


def _ref_linear(x, w, b):
    return jnp.dot(x, w, precision=jax.lax.Precision.HIGHEST) + b


def _ref_mha(p, q_in, kv_in, bias, n_heads):
    B, Sq, D = q_in.shape
    Sk = kv_in.shape[1]
    Dh = D // n_heads

    def split(x, S):
        return x.reshape(B, S, n_heads, Dh).transpose(0, 2, 1, 3)

    q = split(_ref_linear(q_in, p["wq"], p["bq"]), Sq)
    k = split(_ref_linear(kv_in, p["wk"], p["bk"]), Sk)
    v = split(_ref_linear(kv_in, p["wv"], p["bv"]), Sk)
    s = jnp.einsum("bhqd,bhkd->bhqk", q, k,
                   precision=jax.lax.Precision.HIGHEST) / math.sqrt(Dh)
    s = s + bias[None]
    a = jax.nn.softmax(s, axis=-1)
    ctx = jnp.einsum("bhqk,bhkd->bhqd", a, v,
                     precision=jax.lax.Precision.HIGHEST)
    ctx = ctx.transpose(0, 2, 1, 3).reshape(B, Sq, D)
    return _ref_linear(ctx, p["wo"], p["bo"])


def _ref_block(p, dec, enc, self_bias, cross_bias, n_heads):
    norm_dec = _ref_layernorm(dec, p["self_norm_g"], p["self_norm_b"])
    res1 = dec + _ref_mha(p["self_attn"], norm_dec, norm_dec, self_bias, n_heads)
    norm_tgt = _ref_layernorm(res1, p["cross_norm_t_g"], p["cross_norm_t_b"])
    norm_enc = _ref_layernorm(enc, p["cross_norm_s_g"], p["cross_norm_s_b"])
    res2 = res1 + _ref_mha(p["cross_attn"], norm_tgt, norm_enc, cross_bias, n_heads)
    ff_in = _ref_layernorm(res2, p["ff_norm_g"], p["ff_norm_b"])
    h = jnp.maximum(_ref_linear(ff_in, p["ff_w1"], p["ff_b1"]), 0.0)
    return res2 + _ref_linear(h, p["ff_w2"], p["ff_b2"])


def _ref_decoder_fwd(params, target_input, encoder_output, *, n_heads,
                     mask_future=False, shift_right=False):
    if shift_right:
        target_input = shift_target_sequence_right(target_input)
    x = _ref_linear(target_input, params["embed_w"], params["embed_b"])
    B, S, D = x.shape
    Sk = encoder_output.shape[1]
    self_bias = _causal_bias(S) if mask_future else jnp.zeros((1, S, S), jnp.float32)
    cross_bias = jnp.zeros((1, S, Sk), jnp.float32)
    for blk in params["blocks"]:
        x = _ref_block(blk, x, encoder_output, self_bias, cross_bias, n_heads)
    return _ref_linear(x, params["out_w"], params["out_b"])


# ---------------------------------------------------------------------------
if __name__ == "__main__":
    key = jax.random.PRNGKey(0)
    k_params, k_tgt, k_enc = jax.random.split(key, 3)

    batch, tgt_seq, src_seq = 2, 8, 8
    target_ndims = 16      # raw target feature size fed to the embedding layer
    d_model = 32           # embed_size == hidden_size (required by the residual adds)
    n_heads = 4
    d_filter = 64
    n_layers = 2
    output_size = 16
    assert d_model % n_heads == 0

    params = init_decoder_params(k_params, target_ndims, d_model, d_filter,
                                 n_layers, output_size)
    dev_params = prepare_decoder_params(params)    # one-time pad + bf16 cast + fusion

    target_input = jax.random.normal(k_tgt, (batch, tgt_seq, target_ndims), jnp.float32)
    encoder_output = jax.random.normal(k_enc, (batch, src_seq, d_model), jnp.float32)

    fwd = jax.jit(functools.partial(transformer_decoder_fwd,
                                    n_heads=n_heads, d_model=d_model,
                                    d_filter=d_filter, output_size=output_size,
                                    mask_future=True))
    out = fwd(dev_params, target_input, encoder_output)
    out = jax.block_until_ready(out)

    ref = _ref_decoder_fwd(params, target_input, encoder_output,
                           n_heads=n_heads, mask_future=True)

    assert out.shape == (batch, tgt_seq, output_size), out.shape
    assert bool(jnp.all(jnp.isfinite(out)))
    assert jnp.allclose(out, ref, atol=5e-2, rtol=5e-2), \
        float(jnp.max(jnp.abs(out - ref)))

    print("KERNEL_OK")
</pallas_src>

<mosaic_0001>
module attributes {stable_mosaic.version = 11 : i64} {
  func.func @_layernorm_kernel(%arg0: i32, %arg1: memref<8x32xf32, #tpu.memory_space<vmem>>, %arg2: memref<1x32xf32, #tpu.memory_space<vmem>>, %arg3: memref<1x32xf32, #tpu.memory_space<vmem>>, %arg4: memref<8x32xf32, #tpu.memory_space<vmem>>) attributes {dimension_semantics = [#tpu.dimension_semantics<parallel>], iteration_bounds = array<i64: 2>, scalar_prefetch = 0 : i64, scratch_operands = 0 : i64, tpu.core_type = #tpu.core_type<tc>, window_params = [{transform_indices = @transform_0, window_bounds = array<i64: 8, 32>}, {pipeline_mode = #tpu.pipeline_mode<synchronous>, transform_indices = @transform_1, window_bounds = array<i64: 1, 32>}, {pipeline_mode = #tpu.pipeline_mode<synchronous>, transform_indices = @transform_2, window_bounds = array<i64: 1, 32>}, {transform_indices = @transform_3, window_bounds = array<i64: 8, 32>}]} {
    %c0 = arith.constant 0 : index
    %c0_0 = arith.constant 0 : index
    %0 = vector.load %arg1[%c0, %c0_0] : memref<8x32xf32, #tpu.memory_space<vmem>>, vector<8x32xf32>
    %cst = arith.constant dense<0.000000e+00> : vector<8xf32>
    %1 = vector.multi_reduction <add>, %0, %cst [1] : vector<8x32xf32> to vector<8xf32>
    %2 = vector.shape_cast %1 : vector<8xf32> to vector<8x1xf32>
    %3 = arith.mulf %0, %0 : vector<8x32xf32>
    %cst_1 = arith.constant dense<0.000000e+00> : vector<8xf32>
    %4 = vector.multi_reduction <add>, %3, %cst_1 [1] : vector<8x32xf32> to vector<8xf32>
    %5 = vector.shape_cast %4 : vector<8xf32> to vector<8x1xf32>
    %cst_2 = arith.constant 3.125000e-02 : f32
    %6 = vector.broadcast %cst_2 : f32 to vector<8x1xf32>
    %7 = arith.mulf %2, %6 : vector<8x1xf32>
    %cst_3 = arith.constant 3.125000e-02 : f32
    %8 = vector.broadcast %cst_3 : f32 to vector<8x1xf32>
    %9 = arith.mulf %5, %8 : vector<8x1xf32>
    %10 = arith.mulf %7, %7 : vector<8x1xf32>
    %11 = arith.subf %9, %10 : vector<8x1xf32>
    %cst_4 = arith.constant 0.000000e+00 : f32
    %12 = vector.broadcast %cst_4 : f32 to vector<8x1xf32>
    %13 = arith.maximumf %11, %12 : vector<8x1xf32>
    %cst_5 = arith.constant 9.99999974E-6 : f32
    %14 = vector.broadcast %cst_5 : f32 to vector<8x1xf32>
    %15 = arith.addf %13, %14 : vector<8x1xf32>
    %16 = math.rsqrt %15 : vector<8x1xf32>
    %17 = vector.broadcast %7 : vector<8x1xf32> to vector<8x32xf32>
    %18 = arith.subf %0, %17 : vector<8x32xf32>
    %19 = vector.broadcast %16 : vector<8x1xf32> to vector<8x32xf32>
    %20 = arith.mulf %18, %19 : vector<8x32xf32>
    %c0_6 = arith.constant 0 : index
    %c0_7 = arith.constant 0 : index
    %21 = vector.load %arg2[%c0_6, %c0_7] : memref<1x32xf32, #tpu.memory_space<vmem>>, vector<1x32xf32>
    %22 = vector.broadcast %21 : vector<1x32xf32> to vector<8x32xf32>
    %23 = arith.mulf %20, %22 : vector<8x32xf32>
    %c0_8 = arith.constant 0 : index
    %c0_9 = arith.constant 0 : index
    %24 = vector.load %arg3[%c0_8, %c0_9] : memref<1x32xf32, #tpu.memory_space<vmem>>, vector<1x32xf32>
    %25 = vector.broadcast %24 : vector<1x32xf32> to vector<8x32xf32>
    %26 = arith.addf %23, %25 : vector<8x32xf32>
    %c0_10 = arith.constant 0 : index
    %c0_11 = arith.constant 0 : index
    %27 = vector.load %arg4[%c0_10, %c0_11] : memref<8x32xf32, #tpu.memory_space<vmem>>, vector<8x32xf32>
    tpu.vector_store %arg4[%c0_10, %c0_11], %26 {strides = array<i32>} : memref<8x32xf32, #tpu.memory_space<vmem>>, vector<8x32xf32>,
    return
  }
  func.func @transform_0(%arg0: i32) -> (i32, i32) {
    %c0_i32 = arith.constant 0 : i32
    %c0_i32_0 = arith.constant 0 : i32
    return %arg0, %c0_i32 : i32, i32
  }
  func.func @transform_1(%arg0: i32) -> (i32, i32) {
    %c0_i32 = arith.constant 0 : i32
    %c0_i32_0 = arith.constant 0 : i32
    %c0_i32_1 = arith.constant 0 : i32
    return %c0_i32, %c0_i32_0 : i32, i32
  }
  func.func @transform_2(%arg0: i32) -> (i32, i32) {
    %c0_i32 = arith.constant 0 : i32
    %c0_i32_0 = arith.constant 0 : i32
    %c0_i32_1 = arith.constant 0 : i32
    return %c0_i32, %c0_i32_0 : i32, i32
  }
  func.func @transform_3(%arg0: i32) -> (i32, i32) {
    %c0_i32 = arith.constant 0 : i32
    %c0_i32_0 = arith.constant 0 : i32
    return %arg0, %c0_i32 : i32, i32
  }
}

module attributes {stable_mosaic.version = 11 : i64} {
  func.func @_linear_kernel(%arg0: i32, %arg1: i32, %arg2: i32, %arg3: memref<8x128xf32, #tpu.memory_space<vmem>>, %arg4: memref<128x128xbf16, #tpu.memory_space<vmem>>, %arg5: memref<1x128xf32, #tpu.memory_space<vmem>>, %arg6: memref<8x128xf32, #tpu.memory_space<vmem>>) attributes {dimension_semantics = [#tpu.dimension_semantics<parallel>, #tpu.dimension_semantics<parallel>, #tpu.dimension_semantics<arbitrary>], iteration_bounds = array<i64: 2, 1, 1>, scalar_prefetch = 0 : i64, scratch_operands = 0 : i64, tpu.core_type = #tpu.core_type<tc>, window_params = [{transform_indices = @transform_0, window_bounds = array<i64: 8, 128>}, {transform_indices = @transform_1, window_bounds = array<i64: 128, 128>}, {transform_indices = @transform_2, window_bounds = array<i64: 1, 128>}, {transform_indices = @transform_3, window_bounds = array<i64: 8, 128>}]} {
    %c0_i32 = arith.constant 0 : i32
    %0 = arith.cmpi eq, %arg2, %c0_i32 : i32
    %1 = arith.extui %0 : i1 to i32
    %c0_i32_0 = arith.constant 0 : i32
    %2 = arith.cmpi ne, %1, %c0_i32_0 : i32
    scf.if %2 {
      %cst_10 = arith.constant 0.000000e+00 : f32
      %13 = vector.broadcast %cst_10 : f32 to vector<8x128xf32>
      %c0_11 = arith.constant 0 : index
      %c0_12 = arith.constant 0 : index
      %14 = vector.load %arg6[%c0_11, %c0_12] : memref<8x128xf32, #tpu.memory_space<vmem>>, vector<8x128xf32>
      tpu.vector_store %arg6[%c0_11, %c0_12], %13 {strides = array<i32>} : memref<8x128xf32, #tpu.memory_space<vmem>>, vector<8x128xf32>,
    } else {
    }
    %c0 = arith.constant 0 : index
    %c0_1 = arith.constant 0 : index
    %3 = vector.load %arg6[%c0, %c0_1] : memref<8x128xf32, #tpu.memory_space<vmem>>, vector<8x128xf32>
    %c0_2 = arith.constant 0 : index
    %c0_3 = arith.constant 0 : index
    %4 = vector.load %arg3[%c0_2, %c0_3] : memref<8x128xf32, #tpu.memory_space<vmem>>, vector<8x128xf32>
    %5 = arith.truncf %4 : vector<8x128xf32> to vector<8x128xbf16>
    %c0_4 = arith.constant 0 : index
    %c0_5 = arith.constant 0 : index
    %6 = vector.load %arg4[%c0_4, %c0_5] : memref<128x128xbf16, #tpu.memory_space<vmem>>, vector<128x128xbf16>
    %cst = arith.constant dense<0.000000e+00> : vector<8x128xf32>
    %7 = tpu.matmul %5, %6, %cst {dimension_numbers = #tpu.dot_dimension_numbers<[1], [0], [0], [1], [0, 0, 1, 1], [], []>} : vector<8x128xbf16>, vector<128x128xbf16>, vector<8x128xf32> -> vector<8x128xf32>
    %8 = arith.addf %3, %7 : vector<8x128xf32>
    %c0_6 = arith.constant 0 : index
    %c0_7 = arith.constant 0 : index
    %9 = vector.load %arg6[%c0_6, %c0_7] : memref<8x128xf32, #tpu.memory_space<vmem>>, vector<8x128xf32>
    tpu.vector_store %arg6[%c0_6, %c0_7], %8 {strides = array<i32>} : memref<8x128xf32, #tpu.memory_space<vmem>>, vector<8x128xf32>,
    %c0_i32_8 = arith.constant 0 : i32
    %10 = arith.cmpi eq, %arg2, %c0_i32_8 : i32
    %11 = arith.extui %10 : i1 to i32
    %c0_i32_9 = arith.constant 0 : i32
    %12 = arith.cmpi ne, %11, %c0_i32_9 : i32
    scf.if %12 {
      %c0_10 = arith.constant 0 : index
      %c0_11 = arith.constant 0 : index
      %13 = vector.load %arg6[%c0_10, %c0_11] : memref<8x128xf32, #tpu.memory_space<vmem>>, vector<8x128xf32>
      %c0_12 = arith.constant 0 : index
      %c0_13 = arith.constant 0 : index
      %14 = vector.load %arg5[%c0_12, %c0_13] : memref<1x128xf32, #tpu.memory_space<vmem>>, vector<1x128xf32>
      %15 = vector.broadcast %14 : vector<1x128xf32> to vector<8x128xf32>
      %16 = arith.addf %13, %15 : vector<8x128xf32>
      %c0_14 = arith.constant 0 : index
      %c0_15 = arith.constant 0 : index
      %17 = vector.load %arg6[%c0_14, %c0_15] : memref<8x128xf32, #tpu.memory_space<vmem>>, vector<8x128xf32>
      tpu.vector_store %arg6[%c0_14, %c0_15], %16 {strides = array<i32>} : memref<8x128xf32, #tpu.memory_space<vmem>>, vector<8x128xf32>,
    } else {
    }
    return
  }
  func.func @transform_0(%arg0: i32, %arg1: i32, %arg2: i32) -> (i32, i32) {
    %c0_i32 = arith.constant 0 : i32
    return %arg0, %arg2 : i32, i32
  }
  func.func @transform_1(%arg0: i32, %arg1: i32, %arg2: i32) -> (i32, i32) {
    %c0_i32 = arith.constant 0 : i32
    return %arg2, %arg1 : i32, i32
  }
  func.func @transform_2(%arg0: i32, %arg1: i32, %arg2: i32) -> (i32, i32) {
    %c0_i32 = arith.constant 0 : i32
    %c0_i32_0 = arith.constant 0 : i32
    return %c0_i32, %arg1 : i32, i32
  }
  func.func @transform_3(%arg0: i32, %arg1: i32, %arg2: i32) -> (i32, i32) {
    %c0_i32 = arith.constant 0 : i32
    return %arg0, %arg1 : i32, i32
  }
}

module attributes {stable_mosaic.version = 11 : i64} {
  func.func @_linear_kernel(%arg0: i32, %arg1: i32, %arg2: i32, %arg3: memref<8x128xf32, #tpu.memory_space<vmem>>, %arg4: memref<128x128xbf16, #tpu.memory_space<vmem>>, %arg5: memref<1x128xf32, #tpu.memory_space<vmem>>, %arg6: memref<8x128xf32, #tpu.memory_space<vmem>>) attributes {dimension_semantics = [#tpu.dimension_semantics<parallel>, #tpu.dimension_semantics<parallel>, #tpu.dimension_semantics<arbitrary>], iteration_bounds = array<i64: 2, 1, 1>, scalar_prefetch = 0 : i64, scratch_operands = 0 : i64, tpu.core_type = #tpu.core_type<tc>, window_params = [{transform_indices = @transform_0, window_bounds = array<i64: 8, 128>}, {transform_indices = @transform_1, window_bounds = array<i64: 128, 128>}, {transform_indices = @transform_2, window_bounds = array<i64: 1, 128>}, {transform_indices = @transform_3, window_bounds = array<i64: 8, 128>}]} {
    %c0_i32 = arith.constant 0 : i32
    %0 = arith.cmpi eq, %arg2, %c0_i32 : i32
    %1 = arith.extui %0 : i1 to i32
    %c0_i32_0 = arith.constant 0 : i32
    %2 = arith.cmpi ne, %1, %c0_i32_0 : i32
    scf.if %2 {
      %cst_10 = arith.constant 0.000000e+00 : f32
      %13 = vector.broadcast %cst_10 : f32 to vector<8x128xf32>
      %c0_11 = arith.constant 0 : index
      %c0_12 = arith.constant 0 : index
      %14 = vector.load %arg6[%c0_11, %c0_12] : memref<8x128xf32, #tpu.memory_space<vmem>>, vector<8x128xf32>
      tpu.vector_store %arg6[%c0_11, %c0_12], %13 {strides = array<i32>} : memref<8x128xf32, #tpu.memory_space<vmem>>, vector<8x128xf32>,
    } else {
    }
    %c0 = arith.constant 0 : index
    %c0_1 = arith.constant 0 : index
    %3 = vector.load %arg6[%c0, %c0_1] : memref<8x128xf32, #tpu.memory_space<vmem>>, vector<8x128xf32>
    %c0_2 = arith.constant 0 : index
    %c0_3 = arith.constant 0 : index
    %4 = vector.load %arg3[%c0_2, %c0_3] : memref<8x128xf32, #tpu.memory_space<vmem>>, vector<8x128xf32>
    %5 = arith.truncf %4 : vector<8x128xf32> to vector<8x128xbf16>
    %c0_4 = arith.constant 0 : index
    %c0_5 = arith.constant 0 : index
    %6 = vector.load %arg4[%c0_4, %c0_5] : memref<128x128xbf16, #tpu.memory_space<vmem>>, vector<128x128xbf16>
    %cst = arith.constant dense<0.000000e+00> : vector<8x128xf32>
    %7 = tpu.matmul %5, %6, %cst {dimension_numbers = #tpu.dot_dimension_numbers<[1], [0], [0], [1], [0, 0, 1, 1], [], []>} : vector<8x128xbf16>, vector<128x128xbf16>, vector<8x128xf32> -> vector<8x128xf32>
    %8 = arith.addf %3, %7 : vector<8x128xf32>
    %c0_6 = arith.constant 0 : index
    %c0_7 = arith.constant 0 : index
    %9 = vector.load %arg6[%c0_6, %c0_7] : memref<8x128xf32, #tpu.memory_space<vmem>>, vector<8x128xf32>
    tpu.vector_store %arg6[%c0_6, %c0_7], %8 {strides = array<i32>} : memref<8x128xf32, #tpu.memory_space<vmem>>, vector<8x128xf32>,
    %c0_i32_8 = arith.constant 0 : i32
    %10 = arith.cmpi eq, %arg2, %c0_i32_8 : i32
    %11 = arith.extui %10 : i1 to i32
    %c0_i32_9 = arith.constant 0 : i32
    %12 = arith.cmpi ne, %11, %c0_i32_9 : i32
    scf.if %12 {
      %c0_10 = arith.constant 0 : index
      %c0_11 = arith.constant 0 : index
      %13 = vector.load %arg6[%c0_10, %c0_11] : memref<8x128xf32, #tpu.memory_space<vmem>>, vector<8x128xf32>
      %c0_12 = arith.constant 0 : index
      %c0_13 = arith.constant 0 : index
      %14 = vector.load %arg5[%c0_12, %c0_13] : memref<1x128xf32, #tpu.memory_space<vmem>>, vector<1x128xf32>
      %15 = vector.broadcast %14 : vector<1x128xf32> to vector<8x128xf32>
      %16 = arith.addf %13, %15 : vector<8x128xf32>
      %c0_14 = arith.constant 0 : index
      %c0_15 = arith.constant 0 : index
      %17 = vector.load %arg6[%c0_14, %c0_15] : memref<8x128xf32, #tpu.memory_space<vmem>>, vector<8x128xf32>
      tpu.vector_store %arg6[%c0_14, %c0_15], %16 {strides = array<i32>} : memref<8x128xf32, #tpu.memory_space<vmem>>, vector<8x128xf32>,
    } else {
    }
    return
  }
  func.func @transform_0(%arg0: i32, %arg1: i32, %arg2: i32) -> (i32, i32) {
    %c0_i32 = arith.constant 0 : i32
    return %arg0, %arg2 : i32, i32
  }
  func.func @transform_1(%arg0: i32, %arg1: i32, %arg2: i32) -> (i32, i32) {
    %c0_i32 = arith.constant 0 : i32
    return %arg2, %arg1 : i32, i32
  }
  func.func @transform_2(%arg0: i32, %arg1: i32, %arg2: i32) -> (i32, i32) {
    %c0_i32 = arith.constant 0 : i32
    %c0_i32_0 = arith.constant 0 : i32
    return %c0_i32, %arg1 : i32, i32
  }
  func.func @transform_3(%arg0: i32, %arg1: i32, %arg2: i32) -> (i32, i32) {
    %c0_i32 = arith.constant 0 : i32
    return %arg0, %arg1 : i32, i32
  }
}

module attributes {stable_mosaic.version = 11 : i64} {
  func.func @_mha_kernel(%arg0: i32, %arg1: memref<1x8x96xf32, #tpu.memory_space<vmem>>, %arg2: memref<1x8x32xf32, #tpu.memory_space<vmem>>) attributes {dimension_semantics = [#tpu.dimension_semantics<parallel>], iteration_bounds = array<i64: 2>, scalar_prefetch = 0 : i64, scratch_operands = 0 : i64, tpu.core_type = #tpu.core_type<tc>, window_params = [{transform_indices = @transform_0, window_bounds = array<i64: 1, 8, 96>}, {transform_indices = @transform_1, window_bounds = array<i64: 1, 8, 32>}]} {
    %c0 = arith.constant 0 : index
    %c0_0 = arith.constant 0 : index
    %c0_1 = arith.constant 0 : index
    %0 = vector.load %arg1[%c0, %c0_0, %c0_1] : memref<1x8x96xf32, #tpu.memory_space<vmem>>, vector<1x8x96xf32>
    %1 = vector.shape_cast %0 : vector<1x8x96xf32> to vector<8x96xf32>
    %c0_2 = arith.constant 0 : index
    %c0_3 = arith.constant 0 : index
    %c0_4 = arith.constant 0 : index
    %2 = vector.load %arg1[%c0_2, %c0_3, %c0_4] : memref<1x8x96xf32, #tpu.memory_space<vmem>>, vector<1x8x96xf32>
    %3 = vector.shape_cast %2 : vector<1x8x96xf32> to vector<8x96xf32>
    %4 = tpu.iota {dimensions = array<i32: 0>} : vector<8x8xi32>
    %5 = tpu.iota {dimensions = array<i32: 1>} : vector<8x8xi32>
    %6 = arith.cmpi sge, %4, %5 : vector<8x8xi32>
    %7 = vector.extract_strided_slice %1 {offsets = [0, 0], sizes = [8, 8], strides = [1, 1]} : vector<8x96xf32> to vector<8x8xf32>
    %8 = arith.truncf %7 : vector<8x8xf32> to vector<8x8xbf16>
    %9 = vector.extract_strided_slice %3 {offsets = [0, 32], sizes = [8, 8], strides = [1, 1]} : vector<8x96xf32> to vector<8x8xf32>
    %10 = arith.truncf %9 : vector<8x8xf32> to vector<8x8xbf16>
    %11 = vector.extract_strided_slice %3 {offsets = [0, 64], sizes = [8, 8], strides = [1, 1]} : vector<8x96xf32> to vector<8x8xf32>
    %12 = arith.truncf %11 : vector<8x8xf32> to vector<8x8xbf16>
    %cst = arith.constant dense<0.000000e+00> : vector<8x8xf32>
    %13 = tpu.matmul %8, %10, %cst {dimension_numbers = #tpu.dot_dimension_numbers<[1], [1], [0], [0], [0, 0, 1, 0], [], []>} : vector<8x8xbf16>, vector<8x8xbf16>, vector<8x8xf32> -> vector<8x8xf32>
    %cst_5 = arith.constant 0.353553385 : f32
    %14 = vector.broadcast %cst_5 : f32 to vector<8x8xf32>
    %15 = arith.mulf %13, %14 : vector<8x8xf32>
    %cst_6 = arith.constant -1.000000e+09 : f32
    %16 = vector.broadcast %cst_6 : f32 to vector<8x8xf32>
    %17 = arith.select %6, %15, %16 : vector<8x8xi1>, vector<8x8xf32>
    %cst_7 = arith.constant dense<0xFF800000> : vector<8xf32>
    %18 = vector.multi_reduction <maximumf>, %17, %cst_7 [1] : vector<8x8xf32> to vector<8xf32>
    %19 = vector.shape_cast %18 : vector<8xf32> to vector<8x1xf32>
    %20 = vector.broadcast %19 : vector<8x1xf32> to vector<8x8xf32>
    %21 = arith.subf %17, %20 : vector<8x8xf32>
    %22 = math.exp %21 : vector<8x8xf32>
    %cst_8 = arith.constant dense<0.000000e+00> : vector<8xf32>
    %23 = vector.multi_reduction <add>, %22, %cst_8 [1] : vector<8x8xf32> to vector<8xf32>
    %24 = vector.shape_cast %23 : vector<8xf32> to vector<8x1xf32>
    %25 = arith.truncf %22 : vector<8x8xf32> to vector<8x8xbf16>
    %cst_9 = arith.constant dense<0.000000e+00> : vector<8x8xf32>
    %26 = tpu.matmul %25, %12, %cst_9 {dimension_numbers = #tpu.dot_dimension_numbers<[1], [0], [0], [1], [0, 0, 1, 1], [], []>} : vector<8x8xbf16>, vector<8x8xbf16>, vector<8x8xf32> -> vector<8x8xf32>
    %27 = tpu.reciprocal %24 {approx = true} : vector<8x1xf32> -> vector<8x1xf32>
    %28 = vector.broadcast %27 : vector<8x1xf32> to vector<8x8xf32>
    %29 = arith.mulf %26, %28 : vector<8x8xf32>
    %30 = vector.extract_strided_slice %1 {offsets = [0, 8], sizes = [8, 8], strides = [1, 1]} : vector<8x96xf32> to vector<8x8xf32>
    %31 = arith.truncf %30 : vector<8x8xf32> to vector<8x8xbf16>
    %32 = vector.extract_strided_slice %3 {offsets = [0, 40], sizes = [8, 8], strides = [1, 1]} : vector<8x96xf32> to vector<8x8xf32>
    %33 = arith.truncf %32 : vector<8x8xf32> to vector<8x8xbf16>
    %34 = vector.extract_strided_slice %3 {offsets = [0, 72], sizes = [8, 8], strides = [1, 1]} : vector<8x96xf32> to vector<8x8xf32>
    %35 = arith.truncf %34 : vector<8x8xf32> to vector<8x8xbf16>
    %cst_10 = arith.constant dense<0.000000e+00> : vector<8x8xf32>
    %36 = tpu.matmul %31, %33, %cst_10 {dimension_numbers = #tpu.dot_dimension_numbers<[1], [1], [0], [0], [0, 0, 1, 0], [], []>} : vector<8x8xbf16>, vector<8x8xbf16>, vector<8x8xf32> -> vector<8x8xf32>
    %cst_11 = arith.constant 0.353553385 : f32
    %37 = vector.broadcast %cst_11 : f32 to vector<8x8xf32>
    %38 = arith.mulf %36, %37 : vector<8x8xf32>
    %cst_12 = arith.constant -1.000000e+09 : f32
    %39 = vector.broadcast %cst_12 : f32 to vector<8x8xf32>
    %40 = arith.select %6, %38, %39 : vector<8x8xi1>, vector<8x8xf32>
    %cst_13 = arith.constant dense<0xFF800000> : vector<8xf32>
    %41 = vector.multi_reduction <maximumf>, %40, %cst_13 [1] : vector<8x8xf32> to vector<8xf32>
    %42 = vector.shape_cast %41 : vector<8xf32> to vector<8x1xf32>
    %43 = vector.broadcast %42 : vector<8x1xf32> to vector<8x8xf32>
    %44 = arith.subf %40, %43 : vector<8x8xf32>
    %45 = math.exp %44 : vector<8x8xf32>
    %cst_14 = arith.constant dense<0.000000e+00> : vector<8xf32>
    %46 = vector.multi_reduction <add>, %45, %cst_14 [1] : vector<8x8xf32> to vector<8xf32>
    %47 = vector.shape_cast %46 : vector<8xf32> to vector<8x1xf32>
    %48 = arith.truncf %45 : vector<8x8xf32> to vector<8x8xbf16>
    %cst_15 = arith.constant dense<0.000000e+00> : vector<8x8xf32>
    %49 = tpu.matmul %48, %35, %cst_15 {dimension_numbers = #tpu.dot_dimension_numbers<[1], [0], [0], [1], [0, 0, 1, 1], [], []>} : vector<8x8xbf16>, vector<8x8xbf16>, vector<8x8xf32> -> vector<8x8xf32>
    %50 = tpu.reciprocal %47 {approx = true} : vector<8x1xf32> -> vector<8x1xf32>
    %51 = vector.broadcast %50 : vector<8x1xf32> to vector<8x8xf32>
    %52 = arith.mulf %49, %51 : vector<8x8xf32>
    %53 = vector.extract_strided_slice %1 {offsets = [0, 16], sizes = [8, 8], strides = [1, 1]} : vector<8x96xf32> to vector<8x8xf32>
    %54 = arith.truncf %53 : vector<8x8xf32> to vector<8x8xbf16>
    %55 = vector.extract_strided_slice %3 {offsets = [0, 48], sizes = [8, 8], strides = [1, 1]} : vector<8x96xf32> to vector<8x8xf32>
    %56 = arith.truncf %55 : vector<8x8xf32> to vector<8x8xbf16>
    %57 = vector.extract_strided_slice %3 {offsets = [0, 80], sizes = [8, 8], strides = [1, 1]} : vector<8x96xf32> to vector<8x8xf32>
    %58 = arith.truncf %57 : vector<8x8xf32> to vector<8x8xbf16>
    %cst_16 = arith.constant dense<0.000000e+00> : vector<8x8xf32>
    %59 = tpu.matmul %54, %56, %cst_16 {dimension_numbers = #tpu.dot_dimension_numbers<[1], [1], [0], [0], [0, 0, 1, 0], [], []>} : vector<8x8xbf16>, vector<8x8xbf16>, vector<8x8xf32> -> vector<8x8xf32>
    %cst_17 = arith.constant 0.353553385 : f32
    %60 = vector.broadcast %cst_17 : f32 to vector<8x8xf32>
    %61 = arith.mulf %59, %60 : vector<8x8xf32>
    %cst_18 = arith.constant -1.000000e+09 : f32
    %62 = vector.broadcast %cst_18 : f32 to vector<8x8xf32>
    %63 = arith.select %6, %61, %62 : vector<8x8xi1>, vector<8x8xf32>
    %cst_19 = arith.constant dense<0xFF800000> : vector<8xf32>
    %64 = vector.multi_reduction <maximumf>, %63, %cst_19 [1] : vector<8x8xf32> to vector<8xf32>
    %65 = vector.shape_cast %64 : vector<8xf32> to vector<8x1xf32>
    %66 = vector.broadcast %65 : vector<8x1xf32> to vector<8x8xf32>
    %67 = arith.subf %63, %66 : vector<8x8xf32>
    %68 = math.exp %67 : vector<8x8xf32>
    %cst_20 = arith.constant dense<0.000000e+00> : vector<8xf32>
    %69 = vector.multi_reduction <add>, %68, %cst_20 [1] : vector<8x8xf32> to vector<8xf32>
    %70 = vector.shape_cast %69 : vector<8xf32> to vector<8x1xf32>
    %71 = arith.truncf %68 : vector<8x8xf32> to vector<8x8xbf16>
    %cst_21 = arith.constant dense<0.000000e+00> : vector<8x8xf32>
    %72 = tpu.matmul %71, %58, %cst_21 {dimension_numbers = #tpu.dot_dimension_numbers<[1], [0], [0], [1], [0, 0, 1, 1], [], []>} : vector<8x8xbf16>, vector<8x8xbf16>, vector<8x8xf32> -> vector<8x8xf32>
    %73 = tpu.reciprocal %70 {approx = true} : vector<8x1xf32> -> vector<8x1xf32>
    %74 = vector.broadcast %73 : vector<8x1xf32> to vector<8x8xf32>
    %75 = arith.mulf %72, %74 : vector<8x8xf32>
    %76 = vector.extract_strided_slice %1 {offsets = [0, 24], sizes = [8, 8], strides = [1, 1]} : vector<8x96xf32> to vector<8x8xf32>
    %77 = arith.truncf %76 : vector<8x8xf32> to vector<8x8xbf16>
    %78 = vector.extract_strided_slice %3 {offsets = [0, 56], sizes = [8, 8], strides = [1, 1]} : vector<8x96xf32> to vector<8x8xf32>
    %79 = arith.truncf %78 : vector<8x8xf32> to vector<8x8xbf16>
    %80 = vector.extract_strided_slice %3 {offsets = [0, 88], sizes = [8, 8], strides = [1, 1]} : vector<8x96xf32> to vector<8x8xf32>
    %81 = arith.truncf %80 : vector<8x8xf32> to vector<8x8xbf16>
    %cst_22 = arith.constant dense<0.000000e+00> : vector<8x8xf32>
    %82 = tpu.matmul %77, %79, %cst_22 {dimension_numbers = #tpu.dot_dimension_numbers<[1], [1], [0], [0], [0, 0, 1, 0], [], []>} : vector<8x8xbf16>, vector<8x8xbf16>, vector<8x8xf32> -> vector<8x8xf32>
    %cst_23 = arith.constant 0.353553385 : f32
    %83 = vector.broadcast %cst_23 : f32 to vector<8x8xf32>
    %84 = arith.mulf %82, %83 : vector<8x8xf32>
    %cst_24 = arith.constant -1.000000e+09 : f32
    %85 = vector.broadcast %cst_24 : f32 to vector<8x8xf32>
    %86 = arith.select %6, %84, %85 : vector<8x8xi1>, vector<8x8xf32>
    %cst_25 = arith.constant dense<0xFF800000> : vector<8xf32>
    %87 = vector.multi_reduction <maximumf>, %86, %cst_25 [1] : vector<8x8xf32> to vector<8xf32>
    %88 = vector.shape_cast %87 : vector<8xf32> to vector<8x1xf32>
    %89 = vector.broadcast %88 : vector<8x1xf32> to vector<8x8xf32>
    %90 = arith.subf %86, %89 : vector<8x8xf32>
    %91 = math.exp %90 : vector<8x8xf32>
    %cst_26 = arith.constant dense<0.000000e+00> : vector<8xf32>
    %92 = vector.multi_reduction <add>, %91, %cst_26 [1] : vector<8x8xf32> to vector<8xf32>
    %93 = vector.shape_cast %92 : vector<8xf32> to vector<8x1xf32>
    %94 = arith.truncf %91 : vector<8x8xf32> to vector<8x8xbf16>
    %cst_27 = arith.constant dense<0.000000e+00> : vector<8x8xf32>
    %95 = tpu.matmul %94, %81, %cst_27 {dimension_numbers = #tpu.dot_dimension_numbers<[1], [0], [0], [1], [0, 0, 1, 1], [], []>} : vector<8x8xbf16>, vector<8x8xbf16>, vector<8x8xf32> -> vector<8x8xf32>
    %96 = tpu.reciprocal %93 {approx = true} : vector<8x1xf32> -> vector<8x1xf32>
    %97 = vector.broadcast %96 : vector<8x1xf32> to vector<8x8xf32>
    %98 = arith.mulf %95, %97 : vector<8x8xf32>
    %99 = tpu.concatenate %29, %52, %75, %98 in 1 : vector<8x8xf32>, vector<8x8xf32>, vector<8x8xf32>, vector<8x8xf32> -> vector<8x32xf32>
    %c0_28 = arith.constant 0 : index
    %c0_29 = arith.constant 0 : index
    %c0_30 = arith.constant 0 : index
    %100 = vector.load %arg2[%c0_28, %c0_29, %c0_30] : memref<1x8x32xf32, #tpu.memory_space<vmem>>, vector<1x8x32xf32>
    %101 = vector.shape_cast %100 : vector<1x8x32xf32> to vector<8x32xf32>
    %102 = vector.shape_cast %99 : vector<8x32xf32> to vector<1x8x32xf32>
    tpu.vector_store %arg2[%c0_28, %c0_29, %c0_30], %102 {strides = array<i32>} : memref<1x8x32xf32, #tpu.memory_space<vmem>>, vector<1x8x32xf32>,
    return
  }
  func.func @transform_0(%arg0: i32) -> (i32, i32, i32) {
    %c0_i32 = arith.constant 0 : i32
    %c0_i32_0 = arith.constant 0 : i32
    %c0_i32_1 = arith.constant 0 : i32
    return %arg0, %c0_i32, %c0_i32_0 : i32, i32, i32
  }
  func.func @transform_1(%arg0: i32) -> (i32, i32, i32) {
    %c0_i32 = arith.constant 0 : i32
    %c0_i32_0 = arith.constant 0 : i32
    %c0_i32_1 = arith.constant 0 : i32
    return %arg0, %c0_i32, %c0_i32_0 : i32, i32, i32
  }
}

module attributes {stable_mosaic.version = 11 : i64} {
  func.func @_linear_kernel(%arg0: i32, %arg1: i32, %arg2: i32, %arg3: memref<8x128xf32, #tpu.memory_space<vmem>>, %arg4: memref<128x128xbf16, #tpu.memory_space<vmem>>, %arg5: memref<1x128xf32, #tpu.memory_space<vmem>>, %arg6: memref<8x128xf32, #tpu.memory_space<vmem>>, %arg7: memref<8x128xf32, #tpu.memory_space<vmem>>) attributes {dimension_semantics = [#tpu.dimension_semantics<parallel>, #tpu.dimension_semantics<parallel>, #tpu.dimension_semantics<arbitrary>], iteration_bounds = array<i64: 2, 1, 1>, scalar_prefetch = 0 : i64, scratch_operands = 0 : i64, tpu.core_type = #tpu.core_type<tc>, window_params = [{transform_indices = @transform_0, window_bounds = array<i64: 8, 128>}, {transform_indices = @transform_1, window_bounds = array<i64: 128, 128>}, {transform_indices = @transform_2, window_bounds = array<i64: 1, 128>}, {transform_indices = @transform_3, window_bounds = array<i64: 8, 128>}, {transform_indices = @transform_4, window_bounds = array<i64: 8, 128>}]} {
    %c0_i32 = arith.constant 0 : i32
    %0 = arith.cmpi eq, %arg2, %c0_i32 : i32
    %1 = arith.extui %0 : i1 to i32
    %c0_i32_0 = arith.constant 0 : i32
    %2 = arith.cmpi ne, %1, %c0_i32_0 : i32
    scf.if %2 {
      %cst_10 = arith.constant 0.000000e+00 : f32
      %13 = vector.broadcast %cst_10 : f32 to vector<8x128xf32>
      %c0_11 = arith.constant 0 : index
      %c0_12 = arith.constant 0 : index
      %14 = vector.load %arg7[%c0_11, %c0_12] : memref<8x128xf32, #tpu.memory_space<vmem>>, vector<8x128xf32>
      tpu.vector_store %arg7[%c0_11, %c0_12], %13 {strides = array<i32>} : memref<8x128xf32, #tpu.memory_space<vmem>>, vector<8x128xf32>,
    } else {
    }
    %c0 = arith.constant 0 : index
    %c0_1 = arith.constant 0 : index
    %3 = vector.load %arg7[%c0, %c0_1] : memref<8x128xf32, #tpu.memory_space<vmem>>, vector<8x128xf32>
    %c0_2 = arith.constant 0 : index
    %c0_3 = arith.constant 0 : index
    %4 = vector.load %arg3[%c0_2, %c0_3] : memref<8x128xf32, #tpu.memory_space<vmem>>, vector<8x128xf32>
    %5 = arith.truncf %4 : vector<8x128xf32> to vector<8x128xbf16>
    %c0_4 = arith.constant 0 : index
    %c0_5 = arith.constant 0 : index
    %6 = vector.load %arg4[%c0_4, %c0_5] : memref<128x128xbf16, #tpu.memory_space<vmem>>, vector<128x128xbf16>
    %cst = arith.constant dense<0.000000e+00> : vector<8x128xf32>
    %7 = tpu.matmul %5, %6, %cst {dimension_numbers = #tpu.dot_dimension_numbers<[1], [0], [0], [1], [0, 0, 1, 1], [], []>} : vector<8x128xbf16>, vector<128x128xbf16>, vector<8x128xf32> -> vector<8x128xf32>
    %8 = arith.addf %3, %7 : vector<8x128xf32>
    %c0_6 = arith.constant 0 : index
    %c0_7 = arith.constant 0 : index
    %9 = vector.load %arg7[%c0_6, %c0_7] : memref<8x128xf32, #tpu.memory_space<vmem>>, vector<8x128xf32>
    tpu.vector_store %arg7[%c0_6, %c0_7], %8 {strides = array<i32>} : memref<8x128xf32, #tpu.memory_space<vmem>>, vector<8x128xf32>,
    %c0_i32_8 = arith.constant 0 : i32
    %10 = arith.cmpi eq, %arg2, %c0_i32_8 : i32
    %11 = arith.extui %10 : i1 to i32
    %c0_i32_9 = arith.constant 0 : i32
    %12 = arith.cmpi ne, %11, %c0_i32_9 : i32
    scf.if %12 {
      %c0_10 = arith.constant 0 : index
      %c0_11 = arith.constant 0 : index
      %13 = vector.load %arg7[%c0_10, %c0_11] : memref<8x128xf32, #tpu.memory_space<vmem>>, vector<8x128xf32>
      %c0_12 = arith.constant 0 : index
      %c0_13 = arith.constant 0 : index
      %14 = vector.load %arg5[%c0_12, %c0_13] : memref<1x128xf32, #tpu.memory_space<vmem>>, vector<1x128xf32>
      %15 = vector.broadcast %14 : vector<1x128xf32> to vector<8x128xf32>
      %16 = arith.addf %13, %15 : vector<8x128xf32>
      %c0_14 = arith.constant 0 : index
      %c0_15 = arith.constant 0 : index
      %17 = vector.load %arg6[%c0_14, %c0_15] : memref<8x128xf32, #tpu.memory_space<vmem>>, vector<8x128xf32>
      %18 = arith.addf %16, %17 : vector<8x128xf32>
      %c0_16 = arith.constant 0 : index
      %c0_17 = arith.constant 0 : index
      %19 = vector.load %arg7[%c0_16, %c0_17] : memref<8x128xf32, #tpu.memory_space<vmem>>, vector<8x128xf32>
      tpu.vector_store %arg7[%c0_16, %c0_17], %18 {strides = array<i32>} : memref<8x128xf32, #tpu.memory_space<vmem>>, vector<8x128xf32>,
    } else {
    }
    return
  }
  func.func @transform_0(%arg0: i32, %arg1: i32, %arg2: i32) -> (i32, i32) {
    %c0_i32 = arith.constant 0 : i32
    return %arg0, %arg2 : i32, i32
  }
  func.func @transform_1(%arg0: i32, %arg1: i32, %arg2: i32) -> (i32, i32) {
    %c0_i32 = arith.constant 0 : i32
    return %arg2, %arg1 : i32, i32
  }
  func.func @transform_2(%arg0: i32, %arg1: i32, %arg2: i32) -> (i32, i32) {
    %c0_i32 = arith.constant 0 : i32
    %c0_i32_0 = arith.constant 0 : i32
    return %c0_i32, %arg1 : i32, i32
  }
  func.func @transform_3(%arg0: i32, %arg1: i32, %arg2: i32) -> (i32, i32) {
    %c0_i32 = arith.constant 0 : i32
    return %arg0, %arg1 : i32, i32
  }
  func.func @transform_4(%arg0: i32, %arg1: i32, %arg2: i32) -> (i32, i32) {
    %c0_i32 = arith.constant 0 : i32
    return %arg0, %arg1 : i32, i32
  }
}

module attributes {stable_mosaic.version = 11 : i64} {
  func.func @_linear_kernel(%arg0: i32, %arg1: i32, %arg2: i32, %arg3: memref<8x128xf32, #tpu.memory_space<vmem>>, %arg4: memref<128x128xbf16, #tpu.memory_space<vmem>>, %arg5: memref<1x128xf32, #tpu.memory_space<vmem>>, %arg6: memref<8x128xf32, #tpu.memory_space<vmem>>) attributes {dimension_semantics = [#tpu.dimension_semantics<parallel>, #tpu.dimension_semantics<parallel>, #tpu.dimension_semantics<arbitrary>], iteration_bounds = array<i64: 2, 1, 1>, scalar_prefetch = 0 : i64, scratch_operands = 0 : i64, tpu.core_type = #tpu.core_type<tc>, window_params = [{transform_indices = @transform_0, window_bounds = array<i64: 8, 128>}, {transform_indices = @transform_1, window_bounds = array<i64: 128, 128>}, {transform_indices = @transform_2, window_bounds = array<i64: 1, 128>}, {transform_indices = @transform_3, window_bounds = array<i64: 8, 128>}]} {
    %c0_i32 = arith.constant 0 : i32
    %0 = arith.cmpi eq, %arg2, %c0_i32 : i32
    %1 = arith.extui %0 : i1 to i32
    %c0_i32_0 = arith.constant 0 : i32
    %2 = arith.cmpi ne, %1, %c0_i32_0 : i32
    scf.if %2 {
      %cst_10 = arith.constant 0.000000e+00 : f32
      %13 = vector.broadcast %cst_10 : f32 to vector<8x128xf32>
      %c0_11 = arith.constant 0 : index
      %c0_12 = arith.constant 0 : index
      %14 = vector.load %arg6[%c0_11, %c0_12] : memref<8x128xf32, #tpu.memory_space<vmem>>, vector<8x128xf32>
      tpu.vector_store %arg6[%c0_11, %c0_12], %13 {strides = array<i32>} : memref<8x128xf32, #tpu.memory_space<vmem>>, vector<8x128xf32>,
    } else {
    }
    %c0 = arith.constant 0 : index
    %c0_1 = arith.constant 0 : index
    %3 = vector.load %arg6[%c0, %c0_1] : memref<8x128xf32, #tpu.memory_space<vmem>>, vector<8x128xf32>
    %c0_2 = arith.constant 0 : index
    %c0_3 = arith.constant 0 : index
    %4 = vector.load %arg3[%c0_2, %c0_3] : memref<8x128xf32, #tpu.memory_space<vmem>>, vector<8x128xf32>
    %5 = arith.truncf %4 : vector<8x128xf32> to vector<8x128xbf16>
    %c0_4 = arith.constant 0 : index
    %c0_5 = arith.constant 0 : index
    %6 = vector.load %arg4[%c0_4, %c0_5] : memref<128x128xbf16, #tpu.memory_space<vmem>>, vector<128x128xbf16>
    %cst = arith.constant dense<0.000000e+00> : vector<8x128xf32>
    %7 = tpu.matmul %5, %6, %cst {dimension_numbers = #tpu.dot_dimension_numbers<[1], [0], [0], [1], [0, 0, 1, 1], [], []>} : vector<8x128xbf16>, vector<128x128xbf16>, vector<8x128xf32> -> vector<8x128xf32>
    %8 = arith.addf %3, %7 : vector<8x128xf32>
    %c0_6 = arith.constant 0 : index
    %c0_7 = arith.constant 0 : index
    %9 = vector.load %arg6[%c0_6, %c0_7] : memref<8x128xf32, #tpu.memory_space<vmem>>, vector<8x128xf32>
    tpu.vector_store %arg6[%c0_6, %c0_7], %8 {strides = array<i32>} : memref<8x128xf32, #tpu.memory_space<vmem>>, vector<8x128xf32>,
    %c0_i32_8 = arith.constant 0 : i32
    %10 = arith.cmpi eq, %arg2, %c0_i32_8 : i32
    %11 = arith.extui %10 : i1 to i32
    %c0_i32_9 = arith.constant 0 : i32
    %12 = arith.cmpi ne, %11, %c0_i32_9 : i32
    scf.if %12 {
      %c0_10 = arith.constant 0 : index
      %c0_11 = arith.constant 0 : index
      %13 = vector.load %arg6[%c0_10, %c0_11] : memref<8x128xf32, #tpu.memory_space<vmem>>, vector<8x128xf32>
      %c0_12 = arith.constant 0 : index
      %c0_13 = arith.constant 0 : index
      %14 = vector.load %arg5[%c0_12, %c0_13] : memref<1x128xf32, #tpu.memory_space<vmem>>, vector<1x128xf32>
      %15 = vector.broadcast %14 : vector<1x128xf32> to vector<8x128xf32>
      %16 = arith.addf %13, %15 : vector<8x128xf32>
      %c0_14 = arith.constant 0 : index
      %c0_15 = arith.constant 0 : index
      %17 = vector.load %arg6[%c0_14, %c0_15] : memref<8x128xf32, #tpu.memory_space<vmem>>, vector<8x128xf32>
      tpu.vector_store %arg6[%c0_14, %c0_15], %16 {strides = array<i32>} : memref<8x128xf32, #tpu.memory_space<vmem>>, vector<8x128xf32>,
    } else {
    }
    return
  }
  func.func @transform_0(%arg0: i32, %arg1: i32, %arg2: i32) -> (i32, i32) {
    %c0_i32 = arith.constant 0 : i32
    return %arg0, %arg2 : i32, i32
  }
  func.func @transform_1(%arg0: i32, %arg1: i32, %arg2: i32) -> (i32, i32) {
    %c0_i32 = arith.constant 0 : i32
    return %arg2, %arg1 : i32, i32
  }
  func.func @transform_2(%arg0: i32, %arg1: i32, %arg2: i32) -> (i32, i32) {
    %c0_i32 = arith.constant 0 : i32
    %c0_i32_0 = arith.constant 0 : i32
    return %c0_i32, %arg1 : i32, i32
  }
  func.func @transform_3(%arg0: i32, %arg1: i32, %arg2: i32) -> (i32, i32) {
    %c0_i32 = arith.constant 0 : i32
    return %arg0, %arg1 : i32, i32
  }
}

module attributes {stable_mosaic.version = 11 : i64} {
  func.func @_linear_kernel(%arg0: i32, %arg1: i32, %arg2: i32, %arg3: memref<8x128xf32, #tpu.memory_space<vmem>>, %arg4: memref<128x128xbf16, #tpu.memory_space<vmem>>, %arg5: memref<1x128xf32, #tpu.memory_space<vmem>>, %arg6: memref<8x128xf32, #tpu.memory_space<vmem>>) attributes {dimension_semantics = [#tpu.dimension_semantics<parallel>, #tpu.dimension_semantics<parallel>, #tpu.dimension_semantics<arbitrary>], iteration_bounds = array<i64: 2, 1, 1>, scalar_prefetch = 0 : i64, scratch_operands = 0 : i64, tpu.core_type = #tpu.core_type<tc>, window_params = [{transform_indices = @transform_0, window_bounds = array<i64: 8, 128>}, {transform_indices = @transform_1, window_bounds = array<i64: 128, 128>}, {transform_indices = @transform_2, window_bounds = array<i64: 1, 128>}, {transform_indices = @transform_3, window_bounds = array<i64: 8, 128>}]} {
    %c0_i32 = arith.constant 0 : i32
    %0 = arith.cmpi eq, %arg2, %c0_i32 : i32
    %1 = arith.extui %0 : i1 to i32
    %c0_i32_0 = arith.constant 0 : i32
    %2 = arith.cmpi ne, %1, %c0_i32_0 : i32
    scf.if %2 {
      %cst_10 = arith.constant 0.000000e+00 : f32
      %13 = vector.broadcast %cst_10 : f32 to vector<8x128xf32>
      %c0_11 = arith.constant 0 : index
      %c0_12 = arith.constant 0 : index
      %14 = vector.load %arg6[%c0_11, %c0_12] : memref<8x128xf32, #tpu.memory_space<vmem>>, vector<8x128xf32>
      tpu.vector_store %arg6[%c0_11, %c0_12], %13 {strides = array<i32>} : memref<8x128xf32, #tpu.memory_space<vmem>>, vector<8x128xf32>,
    } else {
    }
    %c0 = arith.constant 0 : index
    %c0_1 = arith.constant 0 : index
    %3 = vector.load %arg6[%c0, %c0_1] : memref<8x128xf32, #tpu.memory_space<vmem>>, vector<8x128xf32>
    %c0_2 = arith.constant 0 : index
    %c0_3 = arith.constant 0 : index
    %4 = vector.load %arg3[%c0_2, %c0_3] : memref<8x128xf32, #tpu.memory_space<vmem>>, vector<8x128xf32>
    %5 = arith.truncf %4 : vector<8x128xf32> to vector<8x128xbf16>
    %c0_4 = arith.constant 0 : index
    %c0_5 = arith.constant 0 : index
    %6 = vector.load %arg4[%c0_4, %c0_5] : memref<128x128xbf16, #tpu.memory_space<vmem>>, vector<128x128xbf16>
    %cst = arith.constant dense<0.000000e+00> : vector<8x128xf32>
    %7 = tpu.matmul %5, %6, %cst {dimension_numbers = #tpu.dot_dimension_numbers<[1], [0], [0], [1], [0, 0, 1, 1], [], []>} : vector<8x128xbf16>, vector<128x128xbf16>, vector<8x128xf32> -> vector<8x128xf32>
    %8 = arith.addf %3, %7 : vector<8x128xf32>
    %c0_6 = arith.constant 0 : index
    %c0_7 = arith.constant 0 : index
    %9 = vector.load %arg6[%c0_6, %c0_7] : memref<8x128xf32, #tpu.memory_space<vmem>>, vector<8x128xf32>
    tpu.vector_store %arg6[%c0_6, %c0_7], %8 {strides = array<i32>} : memref<8x128xf32, #tpu.memory_space<vmem>>, vector<8x128xf32>,
    %c0_i32_8 = arith.constant 0 : i32
    %10 = arith.cmpi eq, %arg2, %c0_i32_8 : i32
    %11 = arith.extui %10 : i1 to i32
    %c0_i32_9 = arith.constant 0 : i32
    %12 = arith.cmpi ne, %11, %c0_i32_9 : i32
    scf.if %12 {
      %c0_10 = arith.constant 0 : index
      %c0_11 = arith.constant 0 : index
      %13 = vector.load %arg6[%c0_10, %c0_11] : memref<8x128xf32, #tpu.memory_space<vmem>>, vector<8x128xf32>
      %c0_12 = arith.constant 0 : index
      %c0_13 = arith.constant 0 : index
      %14 = vector.load %arg5[%c0_12, %c0_13] : memref<1x128xf32, #tpu.memory_space<vmem>>, vector<1x128xf32>
      %15 = vector.broadcast %14 : vector<1x128xf32> to vector<8x128xf32>
      %16 = arith.addf %13, %15 : vector<8x128xf32>
      %c0_14 = arith.constant 0 : index
      %c0_15 = arith.constant 0 : index
      %17 = vector.load %arg6[%c0_14, %c0_15] : memref<8x128xf32, #tpu.memory_space<vmem>>, vector<8x128xf32>
      tpu.vector_store %arg6[%c0_14, %c0_15], %16 {strides = array<i32>} : memref<8x128xf32, #tpu.memory_space<vmem>>, vector<8x128xf32>,
    } else {
    }
    return
  }
  func.func @transform_0(%arg0: i32, %arg1: i32, %arg2: i32) -> (i32, i32) {
    %c0_i32 = arith.constant 0 : i32
    return %arg0, %arg2 : i32, i32
  }
  func.func @transform_1(%arg0: i32, %arg1: i32, %arg2: i32) -> (i32, i32) {
    %c0_i32 = arith.constant 0 : i32
    return %arg2, %arg1 : i32, i32
  }
  func.func @transform_2(%arg0: i32, %arg1: i32, %arg2: i32) -> (i32, i32) {
    %c0_i32 = arith.constant 0 : i32
    %c0_i32_0 = arith.constant 0 : i32
    return %c0_i32, %arg1 : i32, i32
  }
  func.func @transform_3(%arg0: i32, %arg1: i32, %arg2: i32) -> (i32, i32) {
    %c0_i32 = arith.constant 0 : i32
    return %arg0, %arg1 : i32, i32
  }
}

module attributes {stable_mosaic.version = 11 : i64} {
  func.func @_mha_kernel(%arg0: i32, %arg1: memref<1x8x32xf32, #tpu.memory_space<vmem>>, %arg2: memref<1x8x64xf32, #tpu.memory_space<vmem>>, %arg3: memref<1x8x32xf32, #tpu.memory_space<vmem>>) attributes {dimension_semantics = [#tpu.dimension_semantics<parallel>], iteration_bounds = array<i64: 2>, scalar_prefetch = 0 : i64, scratch_operands = 0 : i64, tpu.core_type = #tpu.core_type<tc>, window_params = [{transform_indices = @transform_0, window_bounds = array<i64: 1, 8, 32>}, {transform_indices = @transform_1, window_bounds = array<i64: 1, 8, 64>}, {transform_indices = @transform_2, window_bounds = array<i64: 1, 8, 32>}]} {
    %c0 = arith.constant 0 : index
    %c0_0 = arith.constant 0 : index
    %c0_1 = arith.constant 0 : index
    %0 = vector.load %arg1[%c0, %c0_0, %c0_1] : memref<1x8x32xf32, #tpu.memory_space<vmem>>, vector<1x8x32xf32>
    %1 = vector.shape_cast %0 : vector<1x8x32xf32> to vector<8x32xf32>
    %c0_2 = arith.constant 0 : index
    %c0_3 = arith.constant 0 : index
    %c0_4 = arith.constant 0 : index
    %2 = vector.load %arg2[%c0_2, %c0_3, %c0_4] : memref<1x8x64xf32, #tpu.memory_space<vmem>>, vector<1x8x64xf32>
    %3 = vector.shape_cast %2 : vector<1x8x64xf32> to vector<8x64xf32>
    %4 = vector.extract_strided_slice %1 {offsets = [0, 0], sizes = [8, 8], strides = [1, 1]} : vector<8x32xf32> to vector<8x8xf32>
    %5 = arith.truncf %4 : vector<8x8xf32> to vector<8x8xbf16>
    %6 = vector.extract_strided_slice %3 {offsets = [0, 0], sizes = [8, 8], strides = [1, 1]} : vector<8x64xf32> to vector<8x8xf32>
    %7 = arith.truncf %6 : vector<8x8xf32> to vector<8x8xbf16>
    %8 = vector.extract_strided_slice %3 {offsets = [0, 32], sizes = [8, 8], strides = [1, 1]} : vector<8x64xf32> to vector<8x8xf32>
    %9 = arith.truncf %8 : vector<8x8xf32> to vector<8x8xbf16>
    %cst = arith.constant dense<0.000000e+00> : vector<8x8xf32>
    %10 = tpu.matmul %5, %7, %cst {dimension_numbers = #tpu.dot_dimension_numbers<[1], [1], [0], [0], [0, 0, 1, 0], [], []>} : vector<8x8xbf16>, vector<8x8xbf16>, vector<8x8xf32> -> vector<8x8xf32>
    %cst_5 = arith.constant 0.353553385 : f32
    %11 = vector.broadcast %cst_5 : f32 to vector<8x8xf32>
    %12 = arith.mulf %10, %11 : vector<8x8xf32>
    %cst_6 = arith.constant dense<0xFF800000> : vector<8xf32>
    %13 = vector.multi_reduction <maximumf>, %12, %cst_6 [1] : vector<8x8xf32> to vector<8xf32>
    %14 = vector.shape_cast %13 : vector<8xf32> to vector<8x1xf32>
    %15 = vector.broadcast %14 : vector<8x1xf32> to vector<8x8xf32>
    %16 = arith.subf %12, %15 : vector<8x8xf32>
    %17 = math.exp %16 : vector<8x8xf32>
    %cst_7 = arith.constant dense<0.000000e+00> : vector<8xf32>
    %18 = vector.multi_reduction <add>, %17, %cst_7 [1] : vector<8x8xf32> to vector<8xf32>
    %19 = vector.shape_cast %18 : vector<8xf32> to vector<8x1xf32>
    %20 = arith.truncf %17 : vector<8x8xf32> to vector<8x8xbf16>
    %cst_8 = arith.constant dense<0.000000e+00> : vector<8x8xf32>
    %21 = tpu.matmul %20, %9, %cst_8 {dimension_numbers = #tpu.dot_dimension_numbers<[1], [0], [0], [1], [0, 0, 1, 1], [], []>} : vector<8x8xbf16>, vector<8x8xbf16>, vector<8x8xf32> -> vector<8x8xf32>
    %22 = tpu.reciprocal %19 {approx = true} : vector<8x1xf32> -> vector<8x1xf32>
    %23 = vector.broadcast %22 : vector<8x1xf32> to vector<8x8xf32>
    %24 = arith.mulf %21, %23 : vector<8x8xf32>
    %25 = vector.extract_strided_slice %1 {offsets = [0, 8], sizes = [8, 8], strides = [1, 1]} : vector<8x32xf32> to vector<8x8xf32>
    %26 = arith.truncf %25 : vector<8x8xf32> to vector<8x8xbf16>
    %27 = vector.extract_strided_slice %3 {offsets = [0, 8], sizes = [8, 8], strides = [1, 1]} : vector<8x64xf32> to vector<8x8xf32>
    %28 = arith.truncf %27 : vector<8x8xf32> to vector<8x8xbf16>
    %29 = vector.extract_strided_slice %3 {offsets = [0, 40], sizes = [8, 8], strides = [1, 1]} : vector<8x64xf32> to vector<8x8xf32>
    %30 = arith.truncf %29 : vector<8x8xf32> to vector<8x8xbf16>
    %cst_9 = arith.constant dense<0.000000e+00> : vector<8x8xf32>
    %31 = tpu.matmul %26, %28, %cst_9 {dimension_numbers = #tpu.dot_dimension_numbers<[1], [1], [0], [0], [0, 0, 1, 0], [], []>} : vector<8x8xbf16>, vector<8x8xbf16>, vector<8x8xf32> -> vector<8x8xf32>
    %cst_10 = arith.constant 0.353553385 : f32
    %32 = vector.broadcast %cst_10 : f32 to vector<8x8xf32>
    %33 = arith.mulf %31, %32 : vector<8x8xf32>
    %cst_11 = arith.constant dense<0xFF800000> : vector<8xf32>
    %34 = vector.multi_reduction <maximumf>, %33, %cst_11 [1] : vector<8x8xf32> to vector<8xf32>
    %35 = vector.shape_cast %34 : vector<8xf32> to vector<8x1xf32>
    %36 = vector.broadcast %35 : vector<8x1xf32> to vector<8x8xf32>
    %37 = arith.subf %33, %36 : vector<8x8xf32>
    %38 = math.exp %37 : vector<8x8xf32>
    %cst_12 = arith.constant dense<0.000000e+00> : vector<8xf32>
    %39 = vector.multi_reduction <add>, %38, %cst_12 [1] : vector<8x8xf32> to vector<8xf32>
    %40 = vector.shape_cast %39 : vector<8xf32> to vector<8x1xf32>
    %41 = arith.truncf %38 : vector<8x8xf32> to vector<8x8xbf16>
    %cst_13 = arith.constant dense<0.000000e+00> : vector<8x8xf32>
    %42 = tpu.matmul %41, %30, %cst_13 {dimension_numbers = #tpu.dot_dimension_numbers<[1], [0], [0], [1], [0, 0, 1, 1], [], []>} : vector<8x8xbf16>, vector<8x8xbf16>, vector<8x8xf32> -> vector<8x8xf32>
    %43 = tpu.reciprocal %40 {approx = true} : vector<8x1xf32> -> vector<8x1xf32>
    %44 = vector.broadcast %43 : vector<8x1xf32> to vector<8x8xf32>
    %45 = arith.mulf %42, %44 : vector<8x8xf32>
    %46 = vector.extract_strided_slice %1 {offsets = [0, 16], sizes = [8, 8], strides = [1, 1]} : vector<8x32xf32> to vector<8x8xf32>
    %47 = arith.truncf %46 : vector<8x8xf32> to vector<8x8xbf16>
    %48 = vector.extract_strided_slice %3 {offsets = [0, 16], sizes = [8, 8], strides = [1, 1]} : vector<8x64xf32> to vector<8x8xf32>
    %49 = arith.truncf %48 : vector<8x8xf32> to vector<8x8xbf16>
    %50 = vector.extract_strided_slice %3 {offsets = [0, 48], sizes = [8, 8], strides = [1, 1]} : vector<8x64xf32> to vector<8x8xf32>
    %51 = arith.truncf %50 : vector<8x8xf32> to vector<8x8xbf16>
    %cst_14 = arith.constant dense<0.000000e+00> : vector<8x8xf32>
    %52 = tpu.matmul %47, %49, %cst_14 {dimension_numbers = #tpu.dot_dimension_numbers<[1], [1], [0], [0], [0, 0, 1, 0], [], []>} : vector<8x8xbf16>, vector<8x8xbf16>, vector<8x8xf32> -> vector<8x8xf32>
    %cst_15 = arith.constant 0.353553385 : f32
    %53 = vector.broadcast %cst_15 : f32 to vector<8x8xf32>
    %54 = arith.mulf %52, %53 : vector<8x8xf32>
    %cst_16 = arith.constant dense<0xFF800000> : vector<8xf32>
    %55 = vector.multi_reduction <maximumf>, %54, %cst_16 [1] : vector<8x8xf32> to vector<8xf32>
    %56 = vector.shape_cast %55 : vector<8xf32> to vector<8x1xf32>
    %57 = vector.broadcast %56 : vector<8x1xf32> to vector<8x8xf32>
    %58 = arith.subf %54, %57 : vector<8x8xf32>
    %59 = math.exp %58 : vector<8x8xf32>
    %cst_17 = arith.constant dense<0.000000e+00> : vector<8xf32>
    %60 = vector.multi_reduction <add>, %59, %cst_17 [1] : vector<8x8xf32> to vector<8xf32>
    %61 = vector.shape_cast %60 : vector<8xf32> to vector<8x1xf32>
    %62 = arith.truncf %59 : vector<8x8xf32> to vector<8x8xbf16>
    %cst_18 = arith.constant dense<0.000000e+00> : vector<8x8xf32>
    %63 = tpu.matmul %62, %51, %cst_18 {dimension_numbers = #tpu.dot_dimension_numbers<[1], [0], [0], [1], [0, 0, 1, 1], [], []>} : vector<8x8xbf16>, vector<8x8xbf16>, vector<8x8xf32> -> vector<8x8xf32>
    %64 = tpu.reciprocal %61 {approx = true} : vector<8x1xf32> -> vector<8x1xf32>
    %65 = vector.broadcast %64 : vector<8x1xf32> to vector<8x8xf32>
    %66 = arith.mulf %63, %65 : vector<8x8xf32>
    %67 = vector.extract_strided_slice %1 {offsets = [0, 24], sizes = [8, 8], strides = [1, 1]} : vector<8x32xf32> to vector<8x8xf32>
    %68 = arith.truncf %67 : vector<8x8xf32> to vector<8x8xbf16>
    %69 = vector.extract_strided_slice %3 {offsets = [0, 24], sizes = [8, 8], strides = [1, 1]} : vector<8x64xf32> to vector<8x8xf32>
    %70 = arith.truncf %69 : vector<8x8xf32> to vector<8x8xbf16>
    %71 = vector.extract_strided_slice %3 {offsets = [0, 56], sizes = [8, 8], strides = [1, 1]} : vector<8x64xf32> to vector<8x8xf32>
    %72 = arith.truncf %71 : vector<8x8xf32> to vector<8x8xbf16>
    %cst_19 = arith.constant dense<0.000000e+00> : vector<8x8xf32>
    %73 = tpu.matmul %68, %70, %cst_19 {dimension_numbers = #tpu.dot_dimension_numbers<[1], [1], [0], [0], [0, 0, 1, 0], [], []>} : vector<8x8xbf16>, vector<8x8xbf16>, vector<8x8xf32> -> vector<8x8xf32>
    %cst_20 = arith.constant 0.353553385 : f32
    %74 = vector.broadcast %cst_20 : f32 to vector<8x8xf32>
    %75 = arith.mulf %73, %74 : vector<8x8xf32>
    %cst_21 = arith.constant dense<0xFF800000> : vector<8xf32>
    %76 = vector.multi_reduction <maximumf>, %75, %cst_21 [1] : vector<8x8xf32> to vector<8xf32>
    %77 = vector.shape_cast %76 : vector<8xf32> to vector<8x1xf32>
    %78 = vector.broadcast %77 : vector<8x1xf32> to vector<8x8xf32>
    %79 = arith.subf %75, %78 : vector<8x8xf32>
    %80 = math.exp %79 : vector<8x8xf32>
    %cst_22 = arith.constant dense<0.000000e+00> : vector<8xf32>
    %81 = vector.multi_reduction <add>, %80, %cst_22 [1] : vector<8x8xf32> to vector<8xf32>
    %82 = vector.shape_cast %81 : vector<8xf32> to vector<8x1xf32>
    %83 = arith.truncf %80 : vector<8x8xf32> to vector<8x8xbf16>
    %cst_23 = arith.constant dense<0.000000e+00> : vector<8x8xf32>
    %84 = tpu.matmul %83, %72, %cst_23 {dimension_numbers = #tpu.dot_dimension_numbers<[1], [0], [0], [1], [0, 0, 1, 1], [], []>} : vector<8x8xbf16>, vector<8x8xbf16>, vector<8x8xf32> -> vector<8x8xf32>
    %85 = tpu.reciprocal %82 {approx = true} : vector<8x1xf32> -> vector<8x1xf32>
    %86 = vector.broadcast %85 : vector<8x1xf32> to vector<8x8xf32>
    %87 = arith.mulf %84, %86 : vector<8x8xf32>
    %88 = tpu.concatenate %24, %45, %66, %87 in 1 : vector<8x8xf32>, vector<8x8xf32>, vector<8x8xf32>, vector<8x8xf32> -> vector<8x32xf32>
    %c0_24 = arith.constant 0 : index
    %c0_25 = arith.constant 0 : index
    %c0_26 = arith.constant 0 : index
    %89 = vector.load %arg3[%c0_24, %c0_25, %c0_26] : memref<1x8x32xf32, #tpu.memory_space<vmem>>, vector<1x8x32xf32>
    %90 = vector.shape_cast %89 : vector<1x8x32xf32> to vector<8x32xf32>
    %91 = vector.shape_cast %88 : vector<8x32xf32> to vector<1x8x32xf32>
    tpu.vector_store %arg3[%c0_24, %c0_25, %c0_26], %91 {strides = array<i32>} : memref<1x8x32xf32, #tpu.memory_space<vmem>>, vector<1x8x32xf32>,
    return
  }
  func.func @transform_0(%arg0: i32) -> (i32, i32, i32) {
    %c0_i32 = arith.constant 0 : i32
    %c0_i32_0 = arith.constant 0 : i32
    %c0_i32_1 = arith.constant 0 : i32
    return %arg0, %c0_i32, %c0_i32_0 : i32, i32, i32
  }
  func.func @transform_1(%arg0: i32) -> (i32, i32, i32) {
    %c0_i32 = arith.constant 0 : i32
    %c0_i32_0 = arith.constant 0 : i32
    %c0_i32_1 = arith.constant 0 : i32
    return %arg0, %c0_i32, %c0_i32_0 : i32, i32, i32
  }
  func.func @transform_2(%arg0: i32) -> (i32, i32, i32) {
    %c0_i32 = arith.constant 0 : i32
    %c0_i32_0 = arith.constant 0 : i32
    %c0_i32_1 = arith.constant 0 : i32
    return %arg0, %c0_i32, %c0_i32_0 : i32, i32, i32
  }
}

module attributes {stable_mosaic.version = 11 : i64} {
  func.func @_linear_kernel(%arg0: i32, %arg1: i32, %arg2: i32, %arg3: memref<8x128xf32, #tpu.memory_space<vmem>>, %arg4: memref<128x128xbf16, #tpu.memory_space<vmem>>, %arg5: memref<1x128xf32, #tpu.memory_space<vmem>>, %arg6: memref<8x128xf32, #tpu.memory_space<vmem>>) attributes {dimension_semantics = [#tpu.dimension_semantics<parallel>, #tpu.dimension_semantics<parallel>, #tpu.dimension_semantics<arbitrary>], iteration_bounds = array<i64: 2, 1, 1>, scalar_prefetch = 0 : i64, scratch_operands = 0 : i64, tpu.core_type = #tpu.core_type<tc>, window_params = [{transform_indices = @transform_0, window_bounds = array<i64: 8, 128>}, {transform_indices = @transform_1, window_bounds = array<i64: 128, 128>}, {transform_indices = @transform_2, window_bounds = array<i64: 1, 128>}, {transform_indices = @transform_3, window_bounds = array<i64: 8, 128>}]} {
    %c0_i32 = arith.constant 0 : i32
    %0 = arith.cmpi eq, %arg2, %c0_i32 : i32
    %1 = arith.extui %0 : i1 to i32
    %c0_i32_0 = arith.constant 0 : i32
    %2 = arith.cmpi ne, %1, %c0_i32_0 : i32
    scf.if %2 {
      %cst_10 = arith.constant 0.000000e+00 : f32
      %13 = vector.broadcast %cst_10 : f32 to vector<8x128xf32>
      %c0_11 = arith.constant 0 : index
      %c0_12 = arith.constant 0 : index
      %14 = vector.load %arg6[%c0_11, %c0_12] : memref<8x128xf32, #tpu.memory_space<vmem>>, vector<8x128xf32>
      tpu.vector_store %arg6[%c0_11, %c0_12], %13 {strides = array<i32>} : memref<8x128xf32, #tpu.memory_space<vmem>>, vector<8x128xf32>,
    } else {
    }
    %c0 = arith.constant 0 : index
    %c0_1 = arith.constant 0 : index
    %3 = vector.load %arg6[%c0, %c0_1] : memref<8x128xf32, #tpu.memory_space<vmem>>, vector<8x128xf32>
    %c0_2 = arith.constant 0 : index
    %c0_3 = arith.constant 0 : index
    %4 = vector.load %arg3[%c0_2, %c0_3] : memref<8x128xf32, #tpu.memory_space<vmem>>, vector<8x128xf32>
    %5 = arith.truncf %4 : vector<8x128xf32> to vector<8x128xbf16>
    %c0_4 = arith.constant 0 : index
    %c0_5 = arith.constant 0 : index
    %6 = vector.load %arg4[%c0_4, %c0_5] : memref<128x128xbf16, #tpu.memory_space<vmem>>, vector<128x128xbf16>
    %cst = arith.constant dense<0.000000e+00> : vector<8x128xf32>
    %7 = tpu.matmul %5, %6, %cst {dimension_numbers = #tpu.dot_dimension_numbers<[1], [0], [0], [1], [0, 0, 1, 1], [], []>} : vector<8x128xbf16>, vector<128x128xbf16>, vector<8x128xf32> -> vector<8x128xf32>
    %8 = arith.addf %3, %7 : vector<8x128xf32>
    %c0_6 = arith.constant 0 : index
    %c0_7 = arith.constant 0 : index
    %9 = vector.load %arg6[%c0_6, %c0_7] : memref<8x128xf32, #tpu.memory_space<vmem>>, vector<8x128xf32>
    tpu.vector_store %arg6[%c0_6, %c0_7], %8 {strides = array<i32>} : memref<8x128xf32, #tpu.memory_space<vmem>>, vector<8x128xf32>,
    %c0_i32_8 = arith.constant 0 : i32
    %10 = arith.cmpi eq, %arg2, %c0_i32_8 : i32
    %11 = arith.extui %10 : i1 to i32
    %c0_i32_9 = arith.constant 0 : i32
    %12 = arith.cmpi ne, %11, %c0_i32_9 : i32
    scf.if %12 {
      %c0_10 = arith.constant 0 : index
      %c0_11 = arith.constant 0 : index
      %13 = vector.load %arg6[%c0_10, %c0_11] : memref<8x128xf32, #tpu.memory_space<vmem>>, vector<8x128xf32>
      %c0_12 = arith.constant 0 : index
      %c0_13 = arith.constant 0 : index
      %14 = vector.load %arg5[%c0_12, %c0_13] : memref<1x128xf32, #tpu.memory_space<vmem>>, vector<1x128xf32>
      %15 = vector.broadcast %14 : vector<1x128xf32> to vector<8x128xf32>
      %16 = arith.addf %13, %15 : vector<8x128xf32>
      %cst_14 = arith.constant 0.000000e+00 : f32
      %17 = vector.broadcast %cst_14 : f32 to vector<8x128xf32>
      %18 = arith.maximumf %16, %17 : vector<8x128xf32>
      %c0_15 = arith.constant 0 : index
      %c0_16 = arith.constant 0 : index
      %19 = vector.load %arg6[%c0_15, %c0_16] : memref<8x128xf32, #tpu.memory_space<vmem>>, vector<8x128xf32>
      tpu.vector_store %arg6[%c0_15, %c0_16], %18 {strides = array<i32>} : memref<8x128xf32, #tpu.memory_space<vmem>>, vector<8x128xf32>,
    } else {
    }
    return
  }
  func.func @transform_0(%arg0: i32, %arg1: i32, %arg2: i32) -> (i32, i32) {
    %c0_i32 = arith.constant 0 : i32
    return %arg0, %arg2 : i32, i32
  }
  func.func @transform_1(%arg0: i32, %arg1: i32, %arg2: i32) -> (i32, i32) {
    %c0_i32 = arith.constant 0 : i32
    return %arg2, %arg1 : i32, i32
  }
  func.func @transform_2(%arg0: i32, %arg1: i32, %arg2: i32) -> (i32, i32) {
    %c0_i32 = arith.constant 0 : i32
    %c0_i32_0 = arith.constant 0 : i32
    return %c0_i32, %arg1 : i32, i32
  }
  func.func @transform_3(%arg0: i32, %arg1: i32, %arg2: i32) -> (i32, i32) {
    %c0_i32 = arith.constant 0 : i32
    return %arg0, %arg1 : i32, i32
  }
}

module attributes {stable_mosaic.version = 11 : i64} {
  func.func @_linear_kernel(%arg0: i32, %arg1: i32, %arg2: i32, %arg3: memref<8x128xf32, #tpu.memory_space<vmem>>, %arg4: memref<128x128xbf16, #tpu.memory_space<vmem>>, %arg5: memref<1x128xf32, #tpu.memory_space<vmem>>, %arg6: memref<8x128xf32, #tpu.memory_space<vmem>>, %arg7: memref<8x128xf32, #tpu.memory_space<vmem>>) attributes {dimension_semantics = [#tpu.dimension_semantics<parallel>, #tpu.dimension_semantics<parallel>, #tpu.dimension_semantics<arbitrary>], iteration_bounds = array<i64: 2, 1, 1>, scalar_prefetch = 0 : i64, scratch_operands = 0 : i64, tpu.core_type = #tpu.core_type<tc>, window_params = [{transform_indices = @transform_0, window_bounds = array<i64: 8, 128>}, {transform_indices = @transform_1, window_bounds = array<i64: 128, 128>}, {transform_indices = @transform_2, window_bounds = array<i64: 1, 128>}, {transform_indices = @transform_3, window_bounds = array<i64: 8, 128>}, {transform_indices = @transform_4, window_bounds = array<i64: 8, 128>}]} {
    %c0_i32 = arith.constant 0 : i32
    %0 = arith.cmpi eq, %arg2, %c0_i32 : i32
    %1 = arith.extui %0 : i1 to i32
    %c0_i32_0 = arith.constant 0 : i32
    %2 = arith.cmpi ne, %1, %c0_i32_0 : i32
    scf.if %2 {
      %cst_10 = arith.constant 0.000000e+00 : f32
      %13 = vector.broadcast %cst_10 : f32 to vector<8x128xf32>
      %c0_11 = arith.constant 0 : index
      %c0_12 = arith.constant 0 : index
      %14 = vector.load %arg7[%c0_11, %c0_12] : memref<8x128xf32, #tpu.memory_space<vmem>>, vector<8x128xf32>
      tpu.vector_store %arg7[%c0_11, %c0_12], %13 {strides = array<i32>} : memref<8x128xf32, #tpu.memory_space<vmem>>, vector<8x128xf32>,
    } else {
    }
    %c0 = arith.constant 0 : index
    %c0_1 = arith.constant 0 : index
    %3 = vector.load %arg7[%c0, %c0_1] : memref<8x128xf32, #tpu.memory_space<vmem>>, vector<8x128xf32>
    %c0_2 = arith.constant 0 : index
    %c0_3 = arith.constant 0 : index
    %4 = vector.load %arg3[%c0_2, %c0_3] : memref<8x128xf32, #tpu.memory_space<vmem>>, vector<8x128xf32>
    %5 = arith.truncf %4 : vector<8x128xf32> to vector<8x128xbf16>
    %c0_4 = arith.constant 0 : index
    %c0_5 = arith.constant 0 : index
    %6 = vector.load %arg4[%c0_4, %c0_5] : memref<128x128xbf16, #tpu.memory_space<vmem>>, vector<128x128xbf16>
    %cst = arith.constant dense<0.000000e+00> : vector<8x128xf32>
    %7 = tpu.matmul %5, %6, %cst {dimension_numbers = #tpu.dot_dimension_numbers<[1], [0], [0], [1], [0, 0, 1, 1], [], []>} : vector<8x128xbf16>, vector<128x128xbf16>, vector<8x128xf32> -> vector<8x128xf32>
    %8 = arith.addf %3, %7 : vector<8x128xf32>
    %c0_6 = arith.constant 0 : index
    %c0_7 = arith.constant 0 : index
    %9 = vector.load %arg7[%c0_6, %c0_7] : memref<8x128xf32, #tpu.memory_space<vmem>>, vector<8x128xf32>
    tpu.vector_store %arg7[%c0_6, %c0_7], %8 {strides = array<i32>} : memref<8x128xf32, #tpu.memory_space<vmem>>, vector<8x128xf32>,
    %c0_i32_8 = arith.constant 0 : i32
    %10 = arith.cmpi eq, %arg2, %c0_i32_8 : i32
    %11 = arith.extui %10 : i1 to i32
    %c0_i32_9 = arith.constant 0 : i32
    %12 = arith.cmpi ne, %11, %c0_i32_9 : i32
    scf.if %12 {
      %c0_10 = arith.constant 0 : index
      %c0_11 = arith.constant 0 : index
      %13 = vector.load %arg7[%c0_10, %c0_11] : memref<8x128xf32, #tpu.memory_space<vmem>>, vector<8x128xf32>
      %c0_12 = arith.constant 0 : index
      %c0_13 = arith.constant 0 : index
      %14 = vector.load %arg5[%c0_12, %c0_13] : memref<1x128xf32, #tpu.memory_space<vmem>>, vector<1x128xf32>
      %15 = vector.broadcast %14 : vector<1x128xf32> to vector<8x128xf32>
      %16 = arith.addf %13, %15 : vector<8x128xf32>
      %c0_14 = arith.constant 0 : index
      %c0_15 = arith.constant 0 : index
      %17 = vector.load %arg6[%c0_14, %c0_15] : memref<8x128xf32, #tpu.memory_space<vmem>>, vector<8x128xf32>
      %18 = arith.addf %16, %17 : vector<8x128xf32>
      %c0_16 = arith.constant 0 : index
      %c0_17 = arith.constant 0 : index
      %19 = vector.load %arg7[%c0_16, %c0_17] : memref<8x128xf32, #tpu.memory_space<vmem>>, vector<8x128xf32>
      tpu.vector_store %arg7[%c0_16, %c0_17], %18 {strides = array<i32>} : memref<8x128xf32, #tpu.memory_space<vmem>>, vector<8x128xf32>,
    } else {
    }
    return
  }
  func.func @transform_0(%arg0: i32, %arg1: i32, %arg2: i32) -> (i32, i32) {
    %c0_i32 = arith.constant 0 : i32
    return %arg0, %arg2 : i32, i32
  }
  func.func @transform_1(%arg0: i32, %arg1: i32, %arg2: i32) -> (i32, i32) {
    %c0_i32 = arith.constant 0 : i32
    return %arg2, %arg1 : i32, i32
  }
  func.func @transform_2(%arg0: i32, %arg1: i32, %arg2: i32) -> (i32, i32) {
    %c0_i32 = arith.constant 0 : i32
    %c0_i32_0 = arith.constant 0 : i32
    return %c0_i32, %arg1 : i32, i32
  }
  func.func @transform_3(%arg0: i32, %arg1: i32, %arg2: i32) -> (i32, i32) {
    %c0_i32 = arith.constant 0 : i32
    return %arg0, %arg1 : i32, i32
  }
  func.func @transform_4(%arg0: i32, %arg1: i32, %arg2: i32) -> (i32, i32) {
    %c0_i32 = arith.constant 0 : i32
    return %arg0, %arg1 : i32, i32
  }
}

</mosaic_0001>

<bundles_post_ra>
// kernel: transformer_decoder_fwd.28
= control target key start
LH: loop header
LB: loop body
LE: loop exit
PB: predicated region body
PF: predicated region fallthrough
CT: control target
= control target key end

     0   :  { %s616_s12 = smov 0   ;;  %s618_s13 = smov 0   ;;  %s676_s0 = inlined_call_operand.vmem [shape: f32[16,128], index: 0, kind: input, shape index: {}]   ;;  %s677_s1 = inlined_call_operand.vmem [shape: bf16[128,128], index: 1, kind: input, shape index: {}]   ;;  %s678_s2 = inlined_call_operand.vmem [shape: f32[1,128], index: 2, kind: input, shape index: {}]   ;;  %s679_s3 = inlined_call_operand.vmem [shape: f32[16,128], index: 3, kind: output, shape index: {}]  }
   0x1   :  { %s620_s14 = smov 0  }
   0x2 LB: > { %s32_s15 = sadd.s32 1, %s588_s13  ;;  %p493_p0 = scmp.ge.s32.totalorder %s592_s14, 1  ;;  %s592_s14 = sphi %s620_s14, %s13_s14   ;;  %s588_s13 = sphi %s618_s13, %s681_s13   ;;  %s584_s12 = sphi %s616_s12, %s680_s12  }
   0x3   : > { %p34_p1 = scmp.ge.s32.totalorder %s32_s15, 2  ;;  %p186_p2 = scmp.lt.s32.totalorder %s592_s14, 3 }
   0x5   : > { %s683_s15 = smov (%p34_p1, %s32_s15), 0  ;;  %p187_p3 = pnand %p493_p0, %p186_p2 }
   0x6   : > { %v562_v0 = vld [vmem:[%s677_s1] sm:$0xff] (!%p187_p3)   ;;  %v594_v1 = vmov (!%p187_p3), 0.0   ;;  %v563_v2 = vld [vmem:[%s677_s1 + $0x8] sm:$0xff] (!%p187_p3)   ;;  %vm595_vm0 = vmmov (!%p187_p3), 0   ;;  %v564_v3 = vld [vmem:[%s677_s1 + $0x10] sm:$0xff] (!%p187_p3)   ;;  %p225_p4 = scmp.lt.s32.totalorder (!%p187_p3), %s584_s12, 1 }
   0x7   : > { %190 = sbr.rel (%p187_p3) target bundleno = 254 (0xfe), region = 32  ;;  %516 = vmatprep.subr.bf16.mxu0 (!%p187_p3), %v594_v1  ;;  %532 = vmatprep.mubr.msk.bf16.mxu0 (!%p187_p3), %vm595_vm0, %v594_v1  ;;  %v565_v4 = vld [vmem:[%s677_s1 + $0x18] sm:$0xff] (!%p187_p3)   ;;  %v566_v5 = vld [vmem:[%s677_s1 + $0x20] sm:$0xff] (!%p187_p3)   ;;  %v567_v6 = vld [vmem:[%s677_s1 + $0x28] sm:$0xff] (!%p187_p3)  }
   0x8   : > { %517 = vmatpush3.bf16.msra.mxu0 (!%p187_p3), %v562_v0  ;;  %v568_v7 = vld [vmem:[%s677_s1 + $0x30] sm:$0xff] (!%p187_p3)   ;;  %v569_v8 = vld [vmem:[%s677_s1 + $0x38] sm:$0xff] (!%p187_p3)   ;;  %v504_v12 = vld [vmem:[%s678_s2] ss:$0 sm:$0xff] (!%p187_p3) }
   0x9   : > { %518 = vmatprep.subr.bf16.mxu0 (!%p187_p3), %v594_v1 }
   0xc   : > { %519 = vmatpush3.bf16.msra.mxu0 (!%p187_p3), %v563_v2 }
   0xd   : > { %520 = vmatprep.subr.bf16.mxu0 (!%p187_p3), %v594_v1 }
   0xe   : > { %s685_s12 = smov (!%p225_p4, %s584_s12), 1 }
   0xf   : > { %s494_s28 = sshll.u32 %s685_s12, 3 }
  0x10   : > { %521 = vmatpush3.bf16.msra.mxu0 %v564_v3  ;;  %s231_s6 = scalar_lea.vmem %s676_s0, %s494_s28  ;;  %s250_s16 = scalar_lea.vmem %s679_s3, %s494_s28 }
  0x11   : > { %522 = vmatprep.subr.bf16.mxu0 %v594_v1  ;;  %v258_v9 = vld [vmem:[%s231_s6] sm:$0xff] }
  0x12   : > { %v259_v10 = vpack.c.bf16 %v258_v9, %v258_v9 }
  0x14   : > { %523 = vmatpush3.bf16.msra.mxu0 %v565_v4 }
  0x15   : > { %524 = vmatprep.subr.bf16.mxu0 %v594_v1 }
  0x18   : > { %525 = vmatpush3.bf16.msra.mxu0 %v566_v5 }
  0x19   : > { %526 = vmatprep.subr.bf16.mxu0 %v594_v1 }
  0x1c   : > { %527 = vmatpush3.bf16.msra.mxu0 %v567_v6 }
  0x1d   : > { %528 = vmatprep.subr.bf16.mxu0 %v594_v1 }
  0x20   : > { %529 = vmatpush3.bf16.msra.mxu0 %v568_v7 }
  0x21   : > { %530 = vmatprep.subr.bf16.mxu0 %v594_v1 }
  0x24   : > { %531 = vmatpush3.bf16.msra.mxu0 %v569_v8 }
  0x27   : > { %533 = vmatmul.mubr.bf16.vlgmr.msra.gmra.mrb[0].mxu0 %v259_v10 }
  0xfa   : > { %v358_v11 = vpop.f32.mrb[0].mxu0 }
  0xfb   : > { %v534_v13 = vpop.f32.mrb[1].mxu0  ;;  %v377_v15 = vadd.f32 %v504_v12, %v358_v11 }
  0xfc   : > { %v361_v14 = vpop.f32.mrb[2].mxu0 }
  0xfd   : > { %v535_v16 = vpop.f32.mrb[3].mxu0  ;;  %378 = vst [vmem:[%s250_s16] sm:$0xff] %v377_v15 }
  0xfe PF: > { %s13_s14 = sadd.s32 1, %s592_s14   ;;  %s680_s12 = smov %s588_s13 }
  0xff   : > { %p10_p5 = scmp.ge.s32.totalorder %s13_s14, 4   ;;  %s681_s13 = smov %s683_s15 }
 0x101   :  { %12 = sbr.rel (!%p10_p5) target bundleno = 2 (0x2), region = 76 }

// kernel: transformer_decoder_fwd.29
= control target key start
LH: loop header
LB: loop body
LE: loop exit
PB: predicated region body
PF: predicated region fallthrough
CT: control target
= control target key end

     0   :  { %s303_s12 = smov 0   ;;  %s329_s0 = inlined_call_operand.vmem [shape: f32[16,32], index: 0, kind: input, shape index: {}]   ;;  %s330_s1 = inlined_call_operand.vmem [shape: f32[1,32], index: 1, kind: input, shape index: {}]   ;;  %s331_s2 = inlined_call_operand.vmem [shape: f32[1,32], index: 2, kind: input, shape index: {}]   ;;  %s332_s3 = inlined_call_operand.vmem [shape: f32[16,32], index: 3, kind: output, shape index: {}]  }
   0x1 LB: > { %s254_s13 = sadd.s32 4294967295, %s281_s12   ;;  %p258_p0 = scmp.ge.s32.totalorder %s281_s12, 1  ;;  %s281_s12 = sphi %s303_s12, %s13_s12  }
   0x2   : > { %p136_p1 = scmp.lt.s32.totalorder %s281_s12, 3 }
   0x4   : > { %p137_p2 = pnand %p258_p0, %p136_p1 }
   0x5   : > { %p158_p3 = scmp.lt.s32.totalorder (!%p137_p2), %s254_s13, 1  ;;  %vm167_vm0 = vcmask (!%p137_p2), 261120   ;;  %v261_v14 = vld [vmem:[%s330_s1] ss:$0 sm:$0xff] (!%p137_p2) }
   0x6   : > { %140 = sbr.rel (%p137_p2) target bundleno = 190 (0xbe), region = 32  ;;  %v262_v16 = vld [vmem:[%s331_s2] ss:$0 sm:$0xff] (!%p137_p2) }
   0xd   : > { %s334_s13 = smov (!%p158_p3, %s254_s13), 1 }
   0xe   : > { %s259_s14 = sshll.u32 %s334_s13, 3 }
   0xf   : > { %s161_s17 = scalar_lea.vmem %s329_s0, %s259_s14  ;;  %s165_s24 = scalar_lea.vmem %s332_s3, %s259_s14 }
  0x10   : > { %v166_v0 = vld [vmem:[%s161_s17] sm:$0xff] }
  0x11   : > { %v168_v1 = vsel %vm167_vm0, %v166_v0, 0.0  ;;  %v171_v2 = vmul.f32 %v166_v0, %v166_v0 }
  0x12   : > { %169 = vadd.xlane.f32.xlu0 %v168_v1 }
  0x13   : > { %v172_v3 = vsel %vm167_vm0, %v171_v2, 0.0 }
  0x16   : > { %173 = vadd.xlane.f32.xlu0 %v172_v3 }
  0x9f   : > { %v170_v4 = vpop.xlane.xlu0 %169 }
  0xa0   : > { %v175_v5 = vmul.f32 0.03125, %v170_v4 }
  0xa2   : > { %v177_v7 = vmul.f32 %v175_v5, %v175_v5  ;;  %v182_v12 = vsub.f32 %v166_v0, %v175_v5 }
  0xa3   : > { %v174_v6 = vpop.xlane.xlu0 %173 }
  0xa4   : > { %v176_v8 = vmul.f32 0.03125, %v174_v6 }
  0xa6   : > { %v178_v9 = vsub.f32 %v176_v8, %v177_v7 }
  0xa8   : > { %v179_v10 = vmax.f32 %v178_v9, 0.0 }
  0xaa   : > { %v180_v11 = vadd.f32 1e-05, %v179_v10 }
  0xac   : > { %273 = vrsqrt.f32 %v180_v11 }
  0xb6   : > { %v274_v13 = vpop.eup %273 }
  0xb7   : > { %v183_v15 = vmul.f32 %v274_v13, %v182_v12 }
  0xb9   : > { %v191_v17 = vmul.f32 %v261_v14, %v183_v15 }
  0xbb   : > { %v199_v18 = vadd.f32 %v262_v16, %v191_v17 }
  0xbd   : > { %200 = vst.msk [vmem:[%s165_s24] sm:$0xff] %vm167_vm0, %v199_v18 }
  0xbe PF: > { %s13_s12 = sadd.s32 1, %s281_s12  }
  0xbf   : > { %p10_p4 = scmp.ge.s32.totalorder %s13_s12, 4  }
  0xc1   :  { %12 = sbr.rel (!%p10_p4) target bundleno = 1 (0x1), region = 62 }

// kernel: transformer_decoder_fwd.30
= control target key start
LH: loop header
LB: loop body
LE: loop exit
PB: predicated region body
PF: predicated region fallthrough
CT: control target
= control target key end

     0   :  { %s616_s12 = smov 0   ;;  %s618_s13 = smov 0   ;;  %s676_s0 = inlined_call_operand.vmem [shape: f32[16,128], index: 0, kind: input, shape index: {}]   ;;  %s677_s1 = inlined_call_operand.vmem [shape: bf16[128,128], index: 1, kind: input, shape index: {}]   ;;  %s678_s2 = inlined_call_operand.vmem [shape: f32[1,128], index: 2, kind: input, shape index: {}]   ;;  %s679_s3 = inlined_call_operand.vmem [shape: f32[16,128], index: 3, kind: output, shape index: {}]  }
   0x1   :  { %s620_s14 = smov 0  }
   0x2 LB: > { %s32_s15 = sadd.s32 1, %s588_s13  ;;  %p493_p0 = scmp.ge.s32.totalorder %s592_s14, 1  ;;  %s592_s14 = sphi %s620_s14, %s13_s14   ;;  %s588_s13 = sphi %s618_s13, %s681_s13   ;;  %s584_s12 = sphi %s616_s12, %s680_s12  }
   0x3   : > { %p34_p1 = scmp.ge.s32.totalorder %s32_s15, 2  ;;  %p186_p2 = scmp.lt.s32.totalorder %s592_s14, 3 }
   0x5   : > { %s683_s15 = smov (%p34_p1, %s32_s15), 0  ;;  %p187_p3 = pnand %p493_p0, %p186_p2 }
   0x6   : > { %v562_v0 = vld [vmem:[%s677_s1] sm:$0xff] (!%p187_p3)   ;;  %v594_v1 = vmov (!%p187_p3), 0.0   ;;  %v563_v2 = vld [vmem:[%s677_s1 + $0x8] sm:$0xff] (!%p187_p3)   ;;  %vm595_vm0 = vmmov (!%p187_p3), 0   ;;  %v564_v3 = vld [vmem:[%s677_s1 + $0x10] sm:$0xff] (!%p187_p3)   ;;  %p225_p4 = scmp.lt.s32.totalorder (!%p187_p3), %s584_s12, 1 }
   0x7   : > { %190 = sbr.rel (%p187_p3) target bundleno = 254 (0xfe), region = 32  ;;  %516 = vmatprep.subr.bf16.mxu0 (!%p187_p3), %v594_v1  ;;  %532 = vmatprep.mubr.msk.bf16.mxu0 (!%p187_p3), %vm595_vm0, %v594_v1  ;;  %v565_v4 = vld [vmem:[%s677_s1 + $0x18] sm:$0xff] (!%p187_p3)   ;;  %v566_v5 = vld [vmem:[%s677_s1 + $0x20] sm:$0xff] (!%p187_p3)   ;;  %v567_v6 = vld [vmem:[%s677_s1 + $0x28] sm:$0xff] (!%p187_p3)  }
   0x8   : > { %517 = vmatpush3.bf16.msra.mxu0 (!%p187_p3), %v562_v0  ;;  %v568_v7 = vld [vmem:[%s677_s1 + $0x30] sm:$0xff] (!%p187_p3)   ;;  %v569_v8 = vld [vmem:[%s677_s1 + $0x38] sm:$0xff] (!%p187_p3)   ;;  %v504_v12 = vld [vmem:[%s678_s2] ss:$0 sm:$0xff] (!%p187_p3) }
   0x9   : > { %518 = vmatprep.subr.bf16.mxu0 (!%p187_p3), %v594_v1 }
   0xc   : > { %519 = vmatpush3.bf16.msra.mxu0 (!%p187_p3), %v563_v2 }
   0xd   : > { %520 = vmatprep.subr.bf16.mxu0 (!%p187_p3), %v594_v1 }
   0xe   : > { %s685_s12 = smov (!%p225_p4, %s584_s12), 1 }
   0xf   : > { %s494_s28 = sshll.u32 %s685_s12, 3 }
  0x10   : > { %521 = vmatpush3.bf16.msra.mxu0 %v564_v3  ;;  %s231_s6 = scalar_lea.vmem %s676_s0, %s494_s28  ;;  %s250_s16 = scalar_lea.vmem %s679_s3, %s494_s28 }
  0x11   : > { %522 = vmatprep.subr.bf16.mxu0 %v594_v1  ;;  %v258_v9 = vld [vmem:[%s231_s6] sm:$0xff] }
  0x12   : > { %v259_v10 = vpack.c.bf16 %v258_v9, %v258_v9 }
  0x14   : > { %523 = vmatpush3.bf16.msra.mxu0 %v565_v4 }
  0x15   : > { %524 = vmatprep.subr.bf16.mxu0 %v594_v1 }
  0x18   : > { %525 = vmatpush3.bf16.msra.mxu0 %v566_v5 }
  0x19   : > { %526 = vmatprep.subr.bf16.mxu0 %v594_v1 }
  0x1c   : > { %527 = vmatpush3.bf16.msra.mxu0 %v567_v6 }
  0x1d   : > { %528 = vmatprep.subr.bf16.mxu0 %v594_v1 }
  0x20   : > { %529 = vmatpush3.bf16.msra.mxu0 %v568_v7 }
  0x21   : > { %530 = vmatprep.subr.bf16.mxu0 %v594_v1 }
  0x24   : > { %531 = vmatpush3.bf16.msra.mxu0 %v569_v8 }
  0x27   : > { %533 = vmatmul.mubr.bf16.vlgmr.msra.gmra.mrb[0].mxu0 %v259_v10 }
  0xfa   : > { %v358_v11 = vpop.f32.mrb[0].mxu0 }
  0xfb   : > { %v534_v13 = vpop.f32.mrb[1].mxu0  ;;  %v377_v15 = vadd.f32 %v504_v12, %v358_v11 }
  0xfc   : > { %v361_v14 = vpop.f32.mrb[2].mxu0 }
  0xfd   : > { %v535_v16 = vpop.f32.mrb[3].mxu0  ;;  %378 = vst [vmem:[%s250_s16] sm:$0xff] %v377_v15 }
  0xfe PF: > { %s13_s14 = sadd.s32 1, %s592_s14   ;;  %s680_s12 = smov %s588_s13 }
  0xff   : > { %p10_p5 = scmp.ge.s32.totalorder %s13_s14, 4   ;;  %s681_s13 = smov %s683_s15 }
 0x101   :  { %12 = sbr.rel (!%p10_p5) target bundleno = 2 (0x2), region = 76 }

// kernel: transformer_decoder_fwd.31
= control target key start
LH: loop header
LB: loop body
LE: loop exit
PB: predicated region body
PF: predicated region fallthrough
CT: control target
= control target key end

     0   :  { %s796_s6 = smov 0   ;;  %s909_s0 = inlined_call_operand.vmem [shape: f32[2,8,96], index: 0, kind: input, shape index: {}]   ;;  %s910_s1 = inlined_call_operand.vmem [shape: f32[2,8,32], index: 1, kind: output, shape index: {}]  }
   0x1 LB: > { %s641_s7 = sadd.s32 4294967295, %s768_s6   ;;  %p645_p0 = scmp.ge.s32.totalorder %s768_s6, 1  ;;  %s768_s6 = sphi %s796_s6, %s11_s6  }
   0x2   : > { %p86_p1 = scmp.lt.s32.totalorder %s768_s6, 3 }
   0x4   : > { %p87_p2 = pnand %p645_p0, %p86_p1 }
   0x5   : > { %p104_p3 = scmp.lt.s32.totalorder (!%p87_p2), %s641_s7, 1  ;;  %v770_v0 = vmov (!%p87_p2), 0.0   ;;  %vm771_vm0 = vmmov (!%p87_p2), 0   ;;  %s772_s12 = smov (!%p87_p2), 96   ;;  %vm123_vm1 = vcmask (!%p87_p2), 64512   ;;  %v114_v5 = vlaneseq (!%p87_p2) }
   0x6   : > { %90 = sbr.rel (%p87_p2) target bundleno = 1247 (0x4df), region = 24  ;;  %674 = vmatprep.subr.bf16.mxu0 (!%p87_p2), %v770_v0  ;;  %676 = vmatprep.mubr.msk.bf16.mxu0 (!%p87_p2), %vm771_vm0, %v770_v0  ;;  %s773_s13 = smov (!%p87_p2), 64   ;;  %vm187_vm3 = vcmask (!%p87_p2), 1043456   ;;  %vm582_vm4 = vcmask (!%p87_p2), 130048   ;;  %vm584_vm5 = vcmask (!%p87_p2), 195584   ;;  %vm586_vm6 = vcmask (!%p87_p2), 261120  }
   0x7   : > { %680 = vmatprep.subr.bf16.mxu1 (!%p87_p2), %v770_v0  ;;  %682 = vmatprep.mubr.msk.bf16.mxu1 (!%p87_p2), %vm771_vm0, %v770_v0  ;;  %s774_s14 = smov (!%p87_p2), 88   ;;  %s775_s15 = smov (!%p87_p2), 120   ;;  %v834_v6 = vshrl.u32 (!%p87_p2), %v114_v5, 7  ;;  %v836_v7 = vand.u32 (!%p87_p2), 127, %v114_v5 }
   0x8   : > { %s776_s16 = smov (!%p87_p2), 80   ;;  %s777_s17 = smov (!%p87_p2), 112  }
   0x9   : > { %s778_s18 = smov (!%p87_p2), 72   ;;  %s779_s19 = smov (!%p87_p2), 104   ;;  %vm118_vm2 = vcmp.ge.s32.totalorder (!%p87_p2), %v834_v6, %v836_v7 }
   0xa   : > { %s780_s20 = smov (!%p87_p2), 56   ;;  %s781_s21 = smov (!%p87_p2), 48  }
   0xb   : > { %s782_s22 = smov (!%p87_p2), 40   ;;  %s783_s23 = smov (!%p87_p2), 8  }
   0xc   : > { %s784_s24 = smov (!%p87_p2), 16   ;;  %s785_s25 = smov (!%p87_p2), 24  }
   0xd   : > { %s912_s7 = smov (!%p104_p3, %s641_s7), 1 }
   0xe   : > { %s646_s8 = sshll.u32 %s912_s7, 3 }
   0xf   : > { %s107_s11 = scalar_lea.vmem %s909_s0, %s646_s8  ;;  %s111_s28 = scalar_lea.vmem %s910_s1, %s646_s8 }
  0x10   : > { %v113_v1 = vld [vmem:[%s107_s11] sm:$0xff] }
  0x11   : > { %v818_v2 = vpack.c.bf16 %v113_v1, %v113_v1 }
  0x13   : > { %121 = vrot.lane.b32.xlu0 %v818_v2, %s772_s12  ;;  %182 = vrot.lane.b32.xlu1 %v818_v2, %s773_s13 }
  0x17   : > { %235 = vrot.lane.b32.xlu1 %v818_v2, %s774_s14 }
  0x1b   : > { %233 = vrot.lane.b32.xlu1 %v818_v2, %s775_s15 }
  0x1f   : > { %347 = vrot.lane.b32.xlu1 %v818_v2, %s776_s16 }
  0x23   : > { %345 = vrot.lane.b32.xlu1 %v818_v2, %s777_s17 }
  0x27   : > { %459 = vrot.lane.b32.xlu1 %v818_v2, %s778_s18 }
  0x2b   : > { %457 = vrot.lane.b32.xlu1 %v818_v2, %s779_s19 }
  0x85   : > { %v122_v3 = vpop.permute.xlu0 %121  ;;  %v183_v15 = vpop.permute.xlu1 %182 }
  0x86   : > { %v128_v4 = vsel %vm123_vm1, %v122_v3, 0  ;;  %v189_v16 = vsel %vm187_vm3, %v183_v15, 0 }
  0x87   : > { %675 = vmatpush3.bf16.xpose.msra.mxu0 %v128_v4  ;;  %681 = vmatpush3.bf16.msra.mxu1 %v189_v16 }
  0x88   : > { %692 = vmatprep.subr.bf16.mxu0 %v770_v0  ;;  %686 = vmatprep.subr.bf16.mxu1 %v770_v0 }
  0x89   : > { %v236_v20 = vpop.permute.xlu1 %235 }
  0x8a   : > { %v241_v23 = vsel %vm123_vm1, %v236_v20, 0 }
  0x8d   : > { %v234_v21 = vpop.permute.xlu1 %233 }
  0x8e   : > { %677 = vmatmul.mubr.msk.bf16.vlgmr.msra.gmra.mrb[0].mxu0 %vm123_vm1, %v818_v2 }
  0x8f   : > { %694 = vmatprep.mubr.msk.bf16.mxu0 %vm771_vm0, %v770_v0 }
  0x91   : > { %v348_v25 = vpop.permute.xlu1 %347 }
  0x92   : > { %v353_v27 = vsel %vm123_vm1, %v348_v25, 0 }
  0x95   : > { %v346_v26 = vpop.permute.xlu1 %345 }
  0x99   : > { %v460_v28 = vpop.permute.xlu1 %459 }
  0x9a   : > { %v465_v29 = vsel %vm123_vm1, %v460_v28, 0 }
  0x9d   : > { %v458_v30 = vpop.permute.xlu1 %457 }
 0x161   : > { %v164_v8 = vpop.f32.mrb[0].mxu0 }
 0x162   : > { %v170_v9 = vmul.f32 0.35355338, %v164_v8  ;;  %v678_v10 = vpop.f32.mrb[1].mxu0 }
 0x163   : > { %v167_v11 = vpop.f32.mrb[2].mxu0 }
 0x164   : > { %v679_v12 = vpop.f32.mrb[3].mxu0  ;;  %v171_v13 = vsel %vm118_vm2, %v170_v9, -1e+09 }
 0x165   : > { %v172_v14 = vsel %vm123_vm1, %v171_v13, -inf }
 0x166   : > { %173 = vmax.xlane.f32.xlu0 %v172_v14 }
 0x17c   : > { %295 = vrot.lane.b32.xlu0 %v818_v2, %s780_s20 }
 0x1f3   : > { %v174_v17 = vpop.xlane.xlu0 %173 }
 0x1f4   : > { %v175_v18 = vsub.f32 %v171_v13, %v174_v17 }
 0x1f6   : > { %v176_v19 = vmul.f32 1.442695, %v175_v18 }
 0x1f7   : > { %v296_v31 = vpop.permute.xlu0 %295 }
 0x1f8   : > { %746 = vpow2.f32 %v176_v19  ;;  %v301_v32 = vsel %vm187_vm3, %v296_v31, 0 }
 0x1f9   : > { %693 = vmatpush3.bf16.msra.mxu0 %v301_v32 }
 0x1fa   : > { %704 = vmatprep.subr.bf16.mxu0 %v770_v0 }
 0x202   : > { %v847_v22 = vpop.eup %746 }
 0x203   : > { %v181_v24 = vpack.c.bf16 %v847_v22, %v847_v22  ;;  %v178_v17 = vsel %vm123_vm1, %v847_v22, 0.0 }
 0x205   : > { %683 = vmatmul.mubr.msk.bf16.vlgmr.msra.gmra.mrb[0].mxu1 %vm123_vm1, %v181_v24 }
 0x206   : > { %687 = vmatpush3.bf16.xpose.msra.mxu1 %v241_v23  ;;  %688 = vmatprep.mubr.msk.bf16.mxu1 %vm771_vm0, %v770_v0 }
 0x207   : > { %698 = vmatprep.subr.bf16.mxu1 %v770_v0 }
 0x20d   : > { %689 = vmatmul.mubr.msk.bf16.vlgmr.msra.gmra.mrb[4].mxu1 %vm123_vm1, %v234_v21 }
 0x20e   : > { %699 = vmatpush3.bf16.xpose.msra.mxu1 %v353_v27  ;;  %700 = vmatprep.mubr.msk.bf16.mxu1 %vm771_vm0, %v770_v0 }
 0x20f   : > { %710 = vmatprep.subr.bf16.mxu1 %v770_v0 }
 0x215   : > { %701 = vmatmul.mubr.msk.bf16.vlgmr.msra.gmra.mrb[8].mxu1 %vm123_vm1, %v346_v26 }
 0x216   : > { %711 = vmatpush3.bf16.xpose.msra.mxu1 %v465_v29  ;;  %712 = vmatprep.mubr.msk.bf16.mxu1 %vm771_vm0, %v770_v0 }
 0x21d   : > { %713 = vmatmul.mubr.msk.bf16.vlgmr.msra.gmra.mrb[12].mxu1 %vm123_vm1, %v458_v30 }
 0x2d8   : > { %v868_v33 = vpop.f32.mrb[0].mxu1 }
 0x2d9   : > { %v684_v34 = vpop.f32.mrb[1].mxu1 }
 0x2da   : > { %v228_v35 = vpop.f32.mrb[2].mxu1 }
 0x2db   : > { %v685_v36 = vpop.f32.mrb[3].mxu1 }
 0x2e0   : > { %v277_v37 = vpop.f32.mrb[4].mxu1 }
 0x2e1   : > { %v283_v38 = vmul.f32 0.35355338, %v277_v37  ;;  %v690_v39 = vpop.f32.mrb[5].mxu1 }
 0x2e2   : > { %v280_v40 = vpop.f32.mrb[6].mxu1 }
 0x2e3   : > { %v691_v41 = vpop.f32.mrb[7].mxu1  ;;  %v284_v42 = vsel %vm118_vm2, %v283_v38, -1e+09 }
 0x2e4   : > { %v285_v43 = vsel %vm123_vm1, %v284_v42, -inf }
 0x2e5   : > { %286 = vmax.xlane.f32.xlu1 %v285_v43 }
 0x2e8   : > { %v389_v44 = vpop.f32.mrb[8].mxu1 }
 0x2e9   : > { %v395_v45 = vmul.f32 0.35355338, %v389_v44  ;;  %v702_v46 = vpop.f32.mrb[9].mxu1 }
 0x2ea   : > { %v392_v47 = vpop.f32.mrb[10].mxu1 }
 0x2eb   : > { %v703_v48 = vpop.f32.mrb[11].mxu1  ;;  %v396_v49 = vsel %vm118_vm2, %v395_v45, -1e+09 }
 0x2ec   : > { %v397_v50 = vsel %vm123_vm1, %v396_v49, -inf }
 0x2ed   : > { %398 = vmax.xlane.f32.xlu0 %v397_v50 }
 0x2f0   : > { %v501_v51 = vpop.f32.mrb[12].mxu1 }
 0x2f1   : > { %v507_v52 = vmul.f32 0.35355338, %v501_v51  ;;  %v714_v53 = vpop.f32.mrb[13].mxu1 }
 0x2f2   : > { %v504_v54 = vpop.f32.mrb[14].mxu1 }
 0x2f3   : > { %v715_v55 = vpop.f32.mrb[15].mxu1  ;;  %v508_v56 = vsel %vm118_vm2, %v507_v52, -1e+09 }
 0x2f4   : > { %v509_v57 = vsel %vm123_vm1, %v508_v56, -inf }
 0x2f5   : > { %510 = vmax.xlane.f32.xlu0 %v509_v57 }
 0x2f6   : > { %407 = vrot.lane.b32.xlu1 %v818_v2, %s781_s21 }
 0x30b   : > { %519 = vrot.lane.b32.xlu0 %v818_v2, %s782_s22 }
 0x372   : > { %v287_v58 = vpop.xlane.xlu1 %286 }
 0x373   : > { %v288_v59 = vsub.f32 %v284_v42, %v287_v58 }
 0x375   : > { %v289_v60 = vmul.f32 1.442695, %v288_v59 }
 0x376   : > { %v408_v1 = vpop.permute.xlu1 %407 }
 0x377   : > { %748 = vpow2.f32 %v289_v60  ;;  %v413_v4 = vsel %vm187_vm3, %v408_v1, 0 }
 0x37a   : > { %v399_v61 = vpop.xlane.xlu0 %398 }
 0x37b   : > { %v400_v62 = vsub.f32 %v396_v49, %v399_v61 }
 0x37d   : > { %v401_v63 = vmul.f32 1.442695, %v400_v62 }
 0x37f   : > { %750 = vpow2.f32 %v401_v63 }
 0x381   : > { %v749_v3 = vpop.eup %748 }
 0x382   : > { %v511_v5 = vpop.xlane.xlu0 %510  ;;  %v291_v6 = vsel %vm123_vm1, %v749_v3, 0.0  ;;  %v294_v7 = vpack.c.bf16 %v749_v3, %v749_v3 }
 0x383   : > { %v512_v8 = vsub.f32 %v508_v56, %v511_v5  ;;  %292 = vadd.xlane.f32.xlu0 %v291_v6 }
 0x384   : > { %695 = vmatmul.mubr.msk.bf16.vlgmr.msra.gmra.mrb[4].mxu0 %vm123_vm1, %v294_v7 }
 0x385   : > { %v513_v2 = vmul.f32 1.442695, %v512_v8  ;;  %705 = vmatpush3.bf16.msra.mxu0 %v413_v4  ;;  %706 = vmatprep.mubr.msk.bf16.mxu0 %vm771_vm0, %v770_v0 }
 0x386   : > { %716 = vmatprep.subr.bf16.mxu0 %v770_v0  ;;  %v520_v9 = vpop.permute.xlu0 %519 }
 0x387   : > { %752 = vpow2.f32 %v513_v2  ;;  %v525_v11 = vsel %vm187_vm3, %v520_v9, 0 }
 0x389   : > { %v751_v10 = vpop.eup %750 }
 0x38a   : > { %v403_v12 = vsel %vm123_vm1, %v751_v10, 0.0  ;;  %v406_v13 = vpack.c.bf16 %v751_v10, %v751_v10 }
 0x38b   : > { %404 = vadd.xlane.f32.xlu1 %v403_v12 }
 0x38c   : > { %707 = vmatmul.mubr.msk.bf16.vlgmr.msra.gmra.mrb[8].mxu0 %vm123_vm1, %v406_v13 }
 0x38d   : > { %717 = vmatpush3.bf16.msra.mxu0 %v525_v11  ;;  %718 = vmatprep.mubr.msk.bf16.mxu0 %vm771_vm0, %v770_v0 }
 0x391   : > { %v753_v14 = vpop.eup %752 }
 0x392   : > { %v515_v15 = vsel %vm123_vm1, %v753_v14, 0.0  ;;  %v518_v16 = vpack.c.bf16 %v753_v14, %v753_v14 }
 0x393   : > { %516 = vadd.xlane.f32.xlu0 %v515_v15 }
 0x394   : > { %719 = vmatmul.mubr.msk.bf16.vlgmr.msra.gmra.mrb[12].mxu0 %vm123_vm1, %v518_v16 }
 0x397   : > { %179 = vadd.xlane.f32.xlu0 %v178_v17 }
 0x410   : > { %v293_v18 = vpop.xlane.xlu0 %292 }
 0x411   : > { %754 = vrcp.f32 %v293_v18 }
 0x418   : > { %v405_v19 = vpop.xlane.xlu1 %404 }
 0x419   : > { %756 = vrcp.f32 %v405_v19 }
 0x41b   : > { %v755_v20 = vpop.eup %754 }
 0x420   : > { %v517_v25 = vpop.xlane.xlu0 %516 }
 0x421   : > { %758 = vrcp.f32 %v517_v25 }
 0x423   : > { %v757_v27 = vpop.eup %756 }
 0x424   : > { %v180_v39 = vpop.xlane.xlu0 %179 }
 0x425   : > { %760 = vrcp.f32 %v180_v39 }
 0x42b   : > { %v759_v32 = vpop.eup %758 }
 0x42f   : > { %v761_v40 = vpop.eup %760 }
 0x430   : > { %v232_v42 = vmul.f32 %v761_v40, %v868_v33 }
 0x457   : > { %v337_v21 = vpop.f32.mrb[4].mxu0 }
 0x458   : > { %v344_v23 = vmul.f32 %v755_v20, %v337_v21  ;;  %v696_v24 = vpop.f32.mrb[5].mxu0 }
 0x459   : > { %v340_v0 = vpop.f32.mrb[6].mxu0 }
 0x45a   : > { %570 = vrot.lane.b32.xlu0 %v344_v23, %s783_s23  ;;  %v697_v26 = vpop.f32.mrb[7].mxu0 }
 0x45f   : > { %v449_v28 = vpop.f32.mrb[8].mxu0 }
 0x460   : > { %v456_v29 = vmul.f32 %v757_v27, %v449_v28  ;;  %v708_v30 = vpop.f32.mrb[9].mxu0 }
 0x461   : > { %v452_v22 = vpop.f32.mrb[10].mxu0 }
 0x462   : > { %574 = vrot.lane.b32.xlu1 %v456_v29, %s784_s24  ;;  %v709_v31 = vpop.f32.mrb[11].mxu0 }
 0x467   : > { %v561_v34 = vpop.f32.mrb[12].mxu0 }
 0x468   : > { %v568_v35 = vmul.f32 %v759_v32, %v561_v34  ;;  %v720_v36 = vpop.f32.mrb[13].mxu0 }
 0x469   : > { %v564_v37 = vpop.f32.mrb[14].mxu0 }
 0x46a   : > { %578 = vrot.lane.b32.xlu0 %v568_v35, %s785_s25  ;;  %v721_v38 = vpop.f32.mrb[15].mxu0 }
 0x4cc   : > { %v571_v41 = vpop.permute.xlu0 %570 }
 0x4cd   : > { %v581_v44 = vsel %vm123_vm1, %v232_v42, %v571_v41 }
 0x4d4   : > { %v575_v43 = vpop.permute.xlu1 %574 }
 0x4d5   : > { %v583_v45 = vsel %vm582_vm4, %v581_v44, %v575_v43 }
 0x4dc   : > { %v579_v46 = vpop.permute.xlu0 %578 }
 0x4dd   : > { %v585_v47 = vsel %vm584_vm5, %v583_v45, %v579_v46 }
 0x4de   : > { %587 = vst.msk [vmem:[%s111_s28] sm:$0xff] %vm586_vm6, %v585_v47 }
 0x4df PF: > { %s11_s6 = sadd.s32 1, %s768_s6  }
 0x4e0   : > { %p8_p4 = scmp.ge.s32.totalorder %s11_s6, 4  }
 0x4e2   :  { %10 = sbr.rel (!%p8_p4) target bundleno = 1 (0x1), region = 54 }

// kernel: transformer_decoder_fwd.32
= control target key start
LH: loop header
LB: loop body
LE: loop exit
PB: predicated region body
PF: predicated region fallthrough
CT: control target
= control target key end

     0   :  { %s694_s15 = smov 0   ;;  %s696_s16 = smov 0   ;;  %s757_s0 = inlined_call_operand.vmem [shape: f32[16,128], index: 0, kind: input, shape index: {}]   ;;  %s758_s1 = inlined_call_operand.vmem [shape: bf16[128,128], index: 1, kind: input, shape index: {}]   ;;  %s759_s2 = inlined_call_operand.vmem [shape: f32[1,128], index: 2, kind: input, shape index: {}]   ;;  %s760_s3 = inlined_call_operand.vmem [shape: f32[16,128], index: 3, kind: input, shape index: {}]   ;;  %s761_s4 = inlined_call_operand.vmem [shape: f32[16,128], index: 4, kind: output, shape index: {}]  }
   0x1   :  { %s698_s17 = smov 0  }
   0x2 LB: > { %s33_s18 = sadd.s32 1, %s661_s16  ;;  %p565_p0 = scmp.ge.s32.totalorder %s665_s17, 1  ;;  %s665_s17 = sphi %s698_s17, %s14_s17   ;;  %s661_s16 = sphi %s696_s16, %s763_s16   ;;  %s657_s15 = sphi %s694_s15, %s762_s15  }
   0x3   : > { %p35_p1 = scmp.ge.s32.totalorder %s33_s18, 2  ;;  %p225_p2 = scmp.lt.s32.totalorder %s665_s17, 3 }
   0x5   : > { %s765_s18 = smov (%p35_p1, %s33_s18), 0  ;;  %p226_p3 = pnand %p565_p0, %p225_p2 }
   0x6   : > { %v635_v0 = vld [vmem:[%s758_s1] sm:$0xff] (!%p226_p3)   ;;  %v667_v1 = vmov (!%p226_p3), 0.0   ;;  %v636_v2 = vld [vmem:[%s758_s1 + $0x8] sm:$0xff] (!%p226_p3)   ;;  %vm668_vm0 = vmmov (!%p226_p3), 0   ;;  %v637_v3 = vld [vmem:[%s758_s1 + $0x10] sm:$0xff] (!%p226_p3)   ;;  %p273_p4 = scmp.lt.s32.totalorder (!%p226_p3), %s657_s15, 1 }
   0x7   : > { %229 = sbr.rel (%p226_p3) target bundleno = 256 (0x100), region = 36  ;;  %589 = vmatprep.subr.bf16.mxu0 (!%p226_p3), %v667_v1  ;;  %605 = vmatprep.mubr.msk.bf16.mxu0 (!%p226_p3), %vm668_vm0, %v667_v1  ;;  %v638_v4 = vld [vmem:[%s758_s1 + $0x18] sm:$0xff] (!%p226_p3)   ;;  %v639_v5 = vld [vmem:[%s758_s1 + $0x20] sm:$0xff] (!%p226_p3)   ;;  %v640_v6 = vld [vmem:[%s758_s1 + $0x28] sm:$0xff] (!%p226_p3)  }
   0x8   : > { %590 = vmatpush3.bf16.msra.mxu0 (!%p226_p3), %v635_v0  ;;  %v641_v7 = vld [vmem:[%s758_s1 + $0x30] sm:$0xff] (!%p226_p3)   ;;  %v642_v8 = vld [vmem:[%s758_s1 + $0x38] sm:$0xff] (!%p226_p3)   ;;  %v577_v12 = vld [vmem:[%s759_s2] ss:$0 sm:$0xff] (!%p226_p3) }
   0x9   : > { %591 = vmatprep.subr.bf16.mxu0 (!%p226_p3), %v667_v1 }
   0xc   : > { %592 = vmatpush3.bf16.msra.mxu0 (!%p226_p3), %v636_v2 }
   0xd   : > { %593 = vmatprep.subr.bf16.mxu0 (!%p226_p3), %v667_v1 }
   0xe   : > { %s767_s15 = smov (!%p273_p4, %s657_s15), 1 }
   0xf   : > { %s566_s5 = sshll.u32 %s767_s15, 3 }
  0x10   : > { %594 = vmatpush3.bf16.msra.mxu0 %v637_v3  ;;  %s279_s10 = scalar_lea.vmem %s757_s0, %s566_s5  ;;  %s298_s15 = scalar_lea.vmem %s760_s3, %s566_s5 }
  0x11   : > { %595 = vmatprep.subr.bf16.mxu0 %v667_v1  ;;  %v313_v9 = vld [vmem:[%s279_s10] sm:$0xff]  ;;  %s305_s23 = scalar_lea.vmem %s761_s4, %s566_s5 }
  0x12   : > { %v314_v10 = vpack.c.bf16 %v313_v9, %v313_v9  ;;  %v433_v14 = vld [vmem:[%s298_s15] sm:$0xff] }
  0x14   : > { %596 = vmatpush3.bf16.msra.mxu0 %v638_v4 }
  0x15   : > { %597 = vmatprep.subr.bf16.mxu0 %v667_v1 }
  0x18   : > { %598 = vmatpush3.bf16.msra.mxu0 %v639_v5 }
  0x19   : > { %599 = vmatprep.subr.bf16.mxu0 %v667_v1 }
  0x1c   : > { %600 = vmatpush3.bf16.msra.mxu0 %v640_v6 }
  0x1d   : > { %601 = vmatprep.subr.bf16.mxu0 %v667_v1 }
  0x20   : > { %602 = vmatpush3.bf16.msra.mxu0 %v641_v7 }
  0x21   : > { %603 = vmatprep.subr.bf16.mxu0 %v667_v1 }
  0x24   : > { %604 = vmatpush3.bf16.msra.mxu0 %v642_v8 }
  0x27   : > { %606 = vmatmul.mubr.bf16.vlgmr.msra.gmra.mrb[0].mxu0 %v314_v10 }
  0xfa   : > { %v413_v11 = vpop.f32.mrb[0].mxu0 }
  0xfb   : > { %v607_v13 = vpop.f32.mrb[1].mxu0  ;;  %v432_v16 = vadd.f32 %v577_v12, %v413_v11 }
  0xfc   : > { %v416_v15 = vpop.f32.mrb[2].mxu0 }
  0xfd   : > { %v608_v17 = vpop.f32.mrb[3].mxu0  ;;  %v434_v18 = vadd.f32 %v433_v14, %v432_v16 }
  0xff   : > { %435 = vst [vmem:[%s305_s23] sm:$0xff] %v434_v18 }
 0x100 PF: > { %s14_s17 = sadd.s32 1, %s665_s17   ;;  %s762_s15 = smov %s661_s16 }
 0x101   : > { %p11_p5 = scmp.ge.s32.totalorder %s14_s17, 4   ;;  %s763_s16 = smov %s765_s18 }
 0x103   :  { %13 = sbr.rel (!%p11_p5) target bundleno = 2 (0x2), region = 83 }

// kernel: transformer_decoder_fwd.35
= control target key start
LH: loop header
LB: loop body
LE: loop exit
PB: predicated region body
PF: predicated region fallthrough
CT: control target
= control target key end

     0   :  { %s616_s12 = smov 0   ;;  %s618_s13 = smov 0   ;;  %s676_s0 = inlined_call_operand.vmem [shape: f32[16,128], index: 0, kind: input, shape index: {}]   ;;  %s677_s1 = inlined_call_operand.vmem [shape: bf16[128,128], index: 1, kind: input, shape index: {}]   ;;  %s678_s2 = inlined_call_operand.vmem [shape: f32[1,128], index: 2, kind: input, shape index: {}]   ;;  %s679_s3 = inlined_call_operand.vmem [shape: f32[16,128], index: 3, kind: output, shape index: {}]  }
   0x1   :  { %s620_s14 = smov 0  }
   0x2 LB: > { %s32_s15 = sadd.s32 1, %s588_s13  ;;  %p493_p0 = scmp.ge.s32.totalorder %s592_s14, 1  ;;  %s592_s14 = sphi %s620_s14, %s13_s14   ;;  %s588_s13 = sphi %s618_s13, %s681_s13   ;;  %s584_s12 = sphi %s616_s12, %s680_s12  }
   0x3   : > { %p34_p1 = scmp.ge.s32.totalorder %s32_s15, 2  ;;  %p186_p2 = scmp.lt.s32.totalorder %s592_s14, 3 }
   0x5   : > { %s683_s15 = smov (%p34_p1, %s32_s15), 0  ;;  %p187_p3 = pnand %p493_p0, %p186_p2 }
   0x6   : > { %v562_v0 = vld [vmem:[%s677_s1] sm:$0xff] (!%p187_p3)   ;;  %v594_v1 = vmov (!%p187_p3), 0.0   ;;  %v563_v2 = vld [vmem:[%s677_s1 + $0x8] sm:$0xff] (!%p187_p3)   ;;  %vm595_vm0 = vmmov (!%p187_p3), 0   ;;  %v564_v3 = vld [vmem:[%s677_s1 + $0x10] sm:$0xff] (!%p187_p3)   ;;  %p225_p4 = scmp.lt.s32.totalorder (!%p187_p3), %s584_s12, 1 }
   0x7   : > { %190 = sbr.rel (%p187_p3) target bundleno = 254 (0xfe), region = 32  ;;  %516 = vmatprep.subr.bf16.mxu0 (!%p187_p3), %v594_v1  ;;  %532 = vmatprep.mubr.msk.bf16.mxu0 (!%p187_p3), %vm595_vm0, %v594_v1  ;;  %v565_v4 = vld [vmem:[%s677_s1 + $0x18] sm:$0xff] (!%p187_p3)   ;;  %v566_v5 = vld [vmem:[%s677_s1 + $0x20] sm:$0xff] (!%p187_p3)   ;;  %v567_v6 = vld [vmem:[%s677_s1 + $0x28] sm:$0xff] (!%p187_p3)  }
   0x8   : > { %517 = vmatpush3.bf16.msra.mxu0 (!%p187_p3), %v562_v0  ;;  %v568_v7 = vld [vmem:[%s677_s1 + $0x30] sm:$0xff] (!%p187_p3)   ;;  %v569_v8 = vld [vmem:[%s677_s1 + $0x38] sm:$0xff] (!%p187_p3)   ;;  %v504_v12 = vld [vmem:[%s678_s2] ss:$0 sm:$0xff] (!%p187_p3) }
   0x9   : > { %518 = vmatprep.subr.bf16.mxu0 (!%p187_p3), %v594_v1 }
   0xc   : > { %519 = vmatpush3.bf16.msra.mxu0 (!%p187_p3), %v563_v2 }
   0xd   : > { %520 = vmatprep.subr.bf16.mxu0 (!%p187_p3), %v594_v1 }
   0xe   : > { %s685_s12 = smov (!%p225_p4, %s584_s12), 1 }
   0xf   : > { %s494_s28 = sshll.u32 %s685_s12, 3 }
  0x10   : > { %521 = vmatpush3.bf16.msra.mxu0 %v564_v3  ;;  %s231_s6 = scalar_lea.vmem %s676_s0, %s494_s28  ;;  %s250_s16 = scalar_lea.vmem %s679_s3, %s494_s28 }
  0x11   : > { %522 = vmatprep.subr.bf16.mxu0 %v594_v1  ;;  %v258_v9 = vld [vmem:[%s231_s6] sm:$0xff] }
  0x12   : > { %v259_v10 = vpack.c.bf16 %v258_v9, %v258_v9 }
  0x14   : > { %523 = vmatpush3.bf16.msra.mxu0 %v565_v4 }
  0x15   : > { %524 = vmatprep.subr.bf16.mxu0 %v594_v1 }
  0x18   : > { %525 = vmatpush3.bf16.msra.mxu0 %v566_v5 }
  0x19   : > { %526 = vmatprep.subr.bf16.mxu0 %v594_v1 }
  0x1c   : > { %527 = vmatpush3.bf16.msra.mxu0 %v567_v6 }
  0x1d   : > { %528 = vmatprep.subr.bf16.mxu0 %v594_v1 }
  0x20   : > { %529 = vmatpush3.bf16.msra.mxu0 %v568_v7 }
  0x21   : > { %530 = vmatprep.subr.bf16.mxu0 %v594_v1 }
  0x24   : > { %531 = vmatpush3.bf16.msra.mxu0 %v569_v8 }
  0x27   : > { %533 = vmatmul.mubr.bf16.vlgmr.msra.gmra.mrb[0].mxu0 %v259_v10 }
  0xfa   : > { %v358_v11 = vpop.f32.mrb[0].mxu0 }
  0xfb   : > { %v534_v13 = vpop.f32.mrb[1].mxu0  ;;  %v377_v15 = vadd.f32 %v504_v12, %v358_v11 }
  0xfc   : > { %v361_v14 = vpop.f32.mrb[2].mxu0 }
  0xfd   : > { %v535_v16 = vpop.f32.mrb[3].mxu0  ;;  %378 = vst [vmem:[%s250_s16] sm:$0xff] %v377_v15 }
  0xfe PF: > { %s13_s14 = sadd.s32 1, %s592_s14   ;;  %s680_s12 = smov %s588_s13 }
  0xff   : > { %p10_p5 = scmp.ge.s32.totalorder %s13_s14, 4   ;;  %s681_s13 = smov %s683_s15 }
 0x101   :  { %12 = sbr.rel (!%p10_p5) target bundleno = 2 (0x2), region = 76 }

// kernel: transformer_decoder_fwd.36
= control target key start
LH: loop header
LB: loop body
LE: loop exit
PB: predicated region body
PF: predicated region fallthrough
CT: control target
= control target key end

     0   :  { %s616_s12 = smov 0   ;;  %s618_s13 = smov 0   ;;  %s676_s0 = inlined_call_operand.vmem [shape: f32[16,128], index: 0, kind: input, shape index: {}]   ;;  %s677_s1 = inlined_call_operand.vmem [shape: bf16[128,128], index: 1, kind: input, shape index: {}]   ;;  %s678_s2 = inlined_call_operand.vmem [shape: f32[1,128], index: 2, kind: input, shape index: {}]   ;;  %s679_s3 = inlined_call_operand.vmem [shape: f32[16,128], index: 3, kind: output, shape index: {}]  }
   0x1   :  { %s620_s14 = smov 0  }
   0x2 LB: > { %s32_s15 = sadd.s32 1, %s588_s13  ;;  %p493_p0 = scmp.ge.s32.totalorder %s592_s14, 1  ;;  %s592_s14 = sphi %s620_s14, %s13_s14   ;;  %s588_s13 = sphi %s618_s13, %s681_s13   ;;  %s584_s12 = sphi %s616_s12, %s680_s12  }
   0x3   : > { %p34_p1 = scmp.ge.s32.totalorder %s32_s15, 2  ;;  %p186_p2 = scmp.lt.s32.totalorder %s592_s14, 3 }
   0x5   : > { %s683_s15 = smov (%p34_p1, %s32_s15), 0  ;;  %p187_p3 = pnand %p493_p0, %p186_p2 }
   0x6   : > { %v562_v0 = vld [vmem:[%s677_s1] sm:$0xff] (!%p187_p3)   ;;  %v594_v1 = vmov (!%p187_p3), 0.0   ;;  %v563_v2 = vld [vmem:[%s677_s1 + $0x8] sm:$0xff] (!%p187_p3)   ;;  %vm595_vm0 = vmmov (!%p187_p3), 0   ;;  %v564_v3 = vld [vmem:[%s677_s1 + $0x10] sm:$0xff] (!%p187_p3)   ;;  %p225_p4 = scmp.lt.s32.totalorder (!%p187_p3), %s584_s12, 1 }
   0x7   : > { %190 = sbr.rel (%p187_p3) target bundleno = 254 (0xfe), region = 32  ;;  %516 = vmatprep.subr.bf16.mxu0 (!%p187_p3), %v594_v1  ;;  %532 = vmatprep.mubr.msk.bf16.mxu0 (!%p187_p3), %vm595_vm0, %v594_v1  ;;  %v565_v4 = vld [vmem:[%s677_s1 + $0x18] sm:$0xff] (!%p187_p3)   ;;  %v566_v5 = vld [vmem:[%s677_s1 + $0x20] sm:$0xff] (!%p187_p3)   ;;  %v567_v6 = vld [vmem:[%s677_s1 + $0x28] sm:$0xff] (!%p187_p3)  }
   0x8   : > { %517 = vmatpush3.bf16.msra.mxu0 (!%p187_p3), %v562_v0  ;;  %v568_v7 = vld [vmem:[%s677_s1 + $0x30] sm:$0xff] (!%p187_p3)   ;;  %v569_v8 = vld [vmem:[%s677_s1 + $0x38] sm:$0xff] (!%p187_p3)   ;;  %v504_v12 = vld [vmem:[%s678_s2] ss:$0 sm:$0xff] (!%p187_p3) }
   0x9   : > { %518 = vmatprep.subr.bf16.mxu0 (!%p187_p3), %v594_v1 }
   0xc   : > { %519 = vmatpush3.bf16.msra.mxu0 (!%p187_p3), %v563_v2 }
   0xd   : > { %520 = vmatprep.subr.bf16.mxu0 (!%p187_p3), %v594_v1 }
   0xe   : > { %s685_s12 = smov (!%p225_p4, %s584_s12), 1 }
   0xf   : > { %s494_s28 = sshll.u32 %s685_s12, 3 }
  0x10   : > { %521 = vmatpush3.bf16.msra.mxu0 %v564_v3  ;;  %s231_s6 = scalar_lea.vmem %s676_s0, %s494_s28  ;;  %s250_s16 = scalar_lea.vmem %s679_s3, %s494_s28 }
  0x11   : > { %522 = vmatprep.subr.bf16.mxu0 %v594_v1  ;;  %v258_v9 = vld [vmem:[%s231_s6] sm:$0xff] }
  0x12   : > { %v259_v10 = vpack.c.bf16 %v258_v9, %v258_v9 }
  0x14   : > { %523 = vmatpush3.bf16.msra.mxu0 %v565_v4 }
  0x15   : > { %524 = vmatprep.subr.bf16.mxu0 %v594_v1 }
  0x18   : > { %525 = vmatpush3.bf16.msra.mxu0 %v566_v5 }
  0x19   : > { %526 = vmatprep.subr.bf16.mxu0 %v594_v1 }
  0x1c   : > { %527 = vmatpush3.bf16.msra.mxu0 %v567_v6 }
  0x1d   : > { %528 = vmatprep.subr.bf16.mxu0 %v594_v1 }
  0x20   : > { %529 = vmatpush3.bf16.msra.mxu0 %v568_v7 }
  0x21   : > { %530 = vmatprep.subr.bf16.mxu0 %v594_v1 }
  0x24   : > { %531 = vmatpush3.bf16.msra.mxu0 %v569_v8 }
  0x27   : > { %533 = vmatmul.mubr.bf16.vlgmr.msra.gmra.mrb[0].mxu0 %v259_v10 }
  0xfa   : > { %v358_v11 = vpop.f32.mrb[0].mxu0 }
  0xfb   : > { %v534_v13 = vpop.f32.mrb[1].mxu0  ;;  %v377_v15 = vadd.f32 %v504_v12, %v358_v11 }
  0xfc   : > { %v361_v14 = vpop.f32.mrb[2].mxu0 }
  0xfd   : > { %v535_v16 = vpop.f32.mrb[3].mxu0  ;;  %378 = vst [vmem:[%s250_s16] sm:$0xff] %v377_v15 }
  0xfe PF: > { %s13_s14 = sadd.s32 1, %s592_s14   ;;  %s680_s12 = smov %s588_s13 }
  0xff   : > { %p10_p5 = scmp.ge.s32.totalorder %s13_s14, 4   ;;  %s681_s13 = smov %s683_s15 }
 0x101   :  { %12 = sbr.rel (!%p10_p5) target bundleno = 2 (0x2), region = 76 }

// kernel: transformer_decoder_fwd.40
= control target key start
LH: loop header
LB: loop body
LE: loop exit
PB: predicated region body
PF: predicated region fallthrough
CT: control target
= control target key end

     0   :  { %s617_s12 = smov 0   ;;  %s619_s13 = smov 0   ;;  %s677_s0 = inlined_call_operand.vmem [shape: f32[16,128], index: 0, kind: input, shape index: {}]   ;;  %s678_s1 = inlined_call_operand.vmem [shape: bf16[128,128], index: 1, kind: input, shape index: {}]   ;;  %s679_s2 = inlined_call_operand.vmem [shape: f32[1,128], index: 2, kind: input, shape index: {}]   ;;  %s680_s3 = inlined_call_operand.vmem [shape: f32[16,128], index: 3, kind: output, shape index: {}]  }
   0x1   :  { %s621_s14 = smov 0  }
   0x2 LB: > { %s32_s15 = sadd.s32 1, %s589_s13  ;;  %p494_p0 = scmp.ge.s32.totalorder %s593_s14, 1  ;;  %s593_s14 = sphi %s621_s14, %s13_s14   ;;  %s589_s13 = sphi %s619_s13, %s682_s13   ;;  %s585_s12 = sphi %s617_s12, %s681_s12  }
   0x3   : > { %p34_p1 = scmp.ge.s32.totalorder %s32_s15, 2  ;;  %p186_p2 = scmp.lt.s32.totalorder %s593_s14, 3 }
   0x5   : > { %s684_s15 = smov (%p34_p1, %s32_s15), 0  ;;  %p187_p3 = pnand %p494_p0, %p186_p2 }
   0x6   : > { %v563_v0 = vld [vmem:[%s678_s1] sm:$0xff] (!%p187_p3)   ;;  %v595_v1 = vmov (!%p187_p3), 0.0   ;;  %v564_v2 = vld [vmem:[%s678_s1 + $0x8] sm:$0xff] (!%p187_p3)   ;;  %vm596_vm0 = vmmov (!%p187_p3), 0   ;;  %v565_v3 = vld [vmem:[%s678_s1 + $0x10] sm:$0xff] (!%p187_p3)   ;;  %p225_p4 = scmp.lt.s32.totalorder (!%p187_p3), %s585_s12, 1 }
   0x7   : > { %190 = sbr.rel (%p187_p3) target bundleno = 256 (0x100), region = 32  ;;  %517 = vmatprep.subr.bf16.mxu0 (!%p187_p3), %v595_v1  ;;  %533 = vmatprep.mubr.msk.bf16.mxu0 (!%p187_p3), %vm596_vm0, %v595_v1  ;;  %v566_v4 = vld [vmem:[%s678_s1 + $0x18] sm:$0xff] (!%p187_p3)   ;;  %v567_v5 = vld [vmem:[%s678_s1 + $0x20] sm:$0xff] (!%p187_p3)   ;;  %v568_v6 = vld [vmem:[%s678_s1 + $0x28] sm:$0xff] (!%p187_p3)  }
   0x8   : > { %518 = vmatpush3.bf16.msra.mxu0 (!%p187_p3), %v563_v0  ;;  %v569_v7 = vld [vmem:[%s678_s1 + $0x30] sm:$0xff] (!%p187_p3)   ;;  %v570_v8 = vld [vmem:[%s678_s1 + $0x38] sm:$0xff] (!%p187_p3)   ;;  %v505_v12 = vld [vmem:[%s679_s2] ss:$0 sm:$0xff] (!%p187_p3) }
   0x9   : > { %519 = vmatprep.subr.bf16.mxu0 (!%p187_p3), %v595_v1 }
   0xc   : > { %520 = vmatpush3.bf16.msra.mxu0 (!%p187_p3), %v564_v2 }
   0xd   : > { %521 = vmatprep.subr.bf16.mxu0 (!%p187_p3), %v595_v1 }
   0xe   : > { %s686_s12 = smov (!%p225_p4, %s585_s12), 1 }
   0xf   : > { %s495_s28 = sshll.u32 %s686_s12, 3 }
  0x10   : > { %522 = vmatpush3.bf16.msra.mxu0 %v565_v3  ;;  %s231_s6 = scalar_lea.vmem %s677_s0, %s495_s28  ;;  %s250_s16 = scalar_lea.vmem %s680_s3, %s495_s28 }
  0x11   : > { %523 = vmatprep.subr.bf16.mxu0 %v595_v1  ;;  %v258_v9 = vld [vmem:[%s231_s6] sm:$0xff] }
  0x12   : > { %v259_v10 = vpack.c.bf16 %v258_v9, %v258_v9 }
  0x14   : > { %524 = vmatpush3.bf16.msra.mxu0 %v566_v4 }
  0x15   : > { %525 = vmatprep.subr.bf16.mxu0 %v595_v1 }
  0x18   : > { %526 = vmatpush3.bf16.msra.mxu0 %v567_v5 }
  0x19   : > { %527 = vmatprep.subr.bf16.mxu0 %v595_v1 }
  0x1c   : > { %528 = vmatpush3.bf16.msra.mxu0 %v568_v6 }
  0x1d   : > { %529 = vmatprep.subr.bf16.mxu0 %v595_v1 }
  0x20   : > { %530 = vmatpush3.bf16.msra.mxu0 %v569_v7 }
  0x21   : > { %531 = vmatprep.subr.bf16.mxu0 %v595_v1 }
  0x24   : > { %532 = vmatpush3.bf16.msra.mxu0 %v570_v8 }
  0x27   : > { %534 = vmatmul.mubr.bf16.vlgmr.msra.gmra.mrb[0].mxu0 %v259_v10 }
  0xfa   : > { %v358_v11 = vpop.f32.mrb[0].mxu0 }
  0xfb   : > { %v535_v13 = vpop.f32.mrb[1].mxu0  ;;  %v377_v15 = vadd.f32 %v505_v12, %v358_v11 }
  0xfc   : > { %v361_v14 = vpop.f32.mrb[2].mxu0 }
  0xfd   : > { %v536_v16 = vpop.f32.mrb[3].mxu0  ;;  %v378_v17 = vmax.f32 %v377_v15, 0.0 }
  0xff   : > { %379 = vst [vmem:[%s250_s16] sm:$0xff] %v378_v17 }
 0x100 PF: > { %s13_s14 = sadd.s32 1, %s593_s14   ;;  %s681_s12 = smov %s589_s13 }
 0x101   : > { %p10_p5 = scmp.ge.s32.totalorder %s13_s14, 4   ;;  %s682_s13 = smov %s684_s15 }
 0x103   :  { %12 = sbr.rel (!%p10_p5) target bundleno = 2 (0x2), region = 76 }

// kernel: transformer_decoder_fwd.37
= control target key start
LH: loop header
LB: loop body
LE: loop exit
PB: predicated region body
PF: predicated region fallthrough
CT: control target
= control target key end

     0   :  { %s842_s9 = smov 0   ;;  %s934_s0 = inlined_call_operand.vmem [shape: f32[2,8,32], index: 0, kind: input, shape index: {}]   ;;  %s935_s1 = inlined_call_operand.vmem [shape: f32[2,8,64], index: 1, kind: input, shape index: {}]   ;;  %s936_s2 = inlined_call_operand.vmem [shape: f32[2,8,32], index: 2, kind: output, shape index: {}]  }
   0x1 LB: > { %s689_s10 = sadd.s32 4294967295, %s813_s9   ;;  %p693_p0 = scmp.ge.s32.totalorder %s813_s9, 1  ;;  %s813_s9 = sphi %s842_s9, %s12_s9  }
   0x2   : > { %p120_p1 = scmp.lt.s32.totalorder %s813_s9, 3 }
   0x4   : > { %p121_p2 = pnand %p693_p0, %p120_p1 }
   0x5   : > { %p144_p3 = scmp.lt.s32.totalorder (!%p121_p2), %s689_s10, 1  ;;  %v815_v0 = vmov (!%p121_p2), 0.0   ;;  %vm816_vm0 = vmmov (!%p121_p2), 0   ;;  %vm161_vm1 = vcmask (!%p121_p2), 64512   ;;  %s817_s18 = smov (!%p121_p2), 120   ;;  %vm225_vm2 = vcmask (!%p121_p2), 1043456  }
   0x6   : > { %124 = sbr.rel (%p121_p2) target bundleno = 1130 (0x46a), region = 28  ;;  %723 = vmatprep.subr.bf16.mxu0 (!%p121_p2), %v815_v0  ;;  %725 = vmatprep.mubr.msk.bf16.mxu0 (!%p121_p2), %vm816_vm0, %v815_v0  ;;  %s818_s19 = smov (!%p121_p2), 112   ;;  %vm618_vm3 = vcmask (!%p121_p2), 130048   ;;  %vm620_vm4 = vcmask (!%p121_p2), 195584   ;;  %vm622_vm5 = vcmask (!%p121_p2), 261120  }
   0x7   : > { %729 = vmatprep.subr.bf16.mxu1 (!%p121_p2), %v815_v0  ;;  %731 = vmatprep.mubr.msk.bf16.mxu1 (!%p121_p2), %vm816_vm0, %v815_v0  ;;  %s819_s20 = smov (!%p121_p2), 104   ;;  %s820_s21 = smov (!%p121_p2), 96  }
   0x8   : > { %s821_s22 = smov (!%p121_p2), 88   ;;  %s822_s23 = smov (!%p121_p2), 72  }
   0x9   : > { %s823_s24 = smov (!%p121_p2), 80   ;;  %s824_s25 = smov (!%p121_p2), 8  }
   0xa   : > { %s825_s26 = smov (!%p121_p2), 16   ;;  %s826_s27 = smov (!%p121_p2), 24  }
   0xd   : > { %s938_s10 = smov (!%p144_p3, %s689_s10), 1 }
   0xe   : > { %s856_s11 = sshll.u32 %s938_s10, 3 }
   0xf   : > { %s151_s14 = scalar_lea.vmem %s935_s1, %s856_s11  ;;  %s147_s17 = scalar_lea.vmem %s934_s0, %s856_s11 }
  0x10   : > { %v158_v1 = vld [vmem:[%s151_s14] sm:$0xff]  ;;  %s155_s30 = scalar_lea.vmem %s936_s2, %s856_s11 }
  0x11   : > { %v862_v2 = vpack.c.bf16 %v158_v1, %v158_v1  ;;  %v157_v4 = vld [vmem:[%s147_s17] sm:$0xff] }
  0x12   : > { %v159_v5 = vpack.c.bf16 %v157_v4, %v157_v4 }
  0x13   : > { %v166_v3 = vsel %vm161_vm1, %v862_v2, 0  ;;  %274 = vrot.lane.b32.xlu1 %v862_v2, %s817_s18 }
  0x14   : > { %724 = vmatpush3.bf16.xpose.msra.mxu0 %v166_v3 }
  0x15   : > { %741 = vmatprep.subr.bf16.mxu0 %v815_v0 }
  0x17   : > { %272 = vrot.lane.b32.xlu1 %v159_v5, %s817_s18 }
  0x1b   : > { %726 = vmatmul.mubr.msk.bf16.vlgmr.msra.gmra.mrb[0].mxu0 %vm161_vm1, %v159_v5  ;;  %385 = vrot.lane.b32.xlu1 %v862_v2, %s818_s19 }
  0x1c   : > { %743 = vmatprep.mubr.msk.bf16.mxu0 %vm816_vm0, %v815_v0 }
  0x1f   : > { %383 = vrot.lane.b32.xlu1 %v159_v5, %s818_s19 }
  0x23   : > { %496 = vrot.lane.b32.xlu1 %v862_v2, %s819_s20 }
  0x27   : > { %494 = vrot.lane.b32.xlu1 %v159_v5, %s819_s20 }
  0x85   : > { %v275_v17 = vpop.permute.xlu1 %274 }
  0x86   : > { %v280_v20 = vsel %vm161_vm1, %v275_v17, 0 }
  0x89   : > { %v273_v18 = vpop.permute.xlu1 %272 }
  0x8d   : > { %v386_v22 = vpop.permute.xlu1 %385 }
  0x8e   : > { %v391_v24 = vsel %vm161_vm1, %v386_v22, 0 }
  0x91   : > { %v384_v23 = vpop.permute.xlu1 %383 }
  0x95   : > { %v497_v25 = vpop.permute.xlu1 %496 }
  0x96   : > { %v502_v26 = vsel %vm161_vm1, %v497_v25, 0 }
  0x99   : > { %v495_v27 = vpop.permute.xlu1 %494 }
  0xee   : > { %v202_v6 = vpop.f32.mrb[0].mxu0 }
  0xef   : > { %v208_v7 = vmul.f32 0.35355338, %v202_v6  ;;  %v727_v8 = vpop.f32.mrb[1].mxu0 }
  0xf0   : > { %v205_v9 = vpop.f32.mrb[2].mxu0 }
  0xf1   : > { %v728_v10 = vpop.f32.mrb[3].mxu0  ;;  %v209_v11 = vsel %vm161_vm1, %v208_v7, -inf }
  0xf2   : > { %210 = vmax.xlane.f32.xlu0 %v209_v11 }
 0x108   : > { %220 = vrot.lane.b32.xlu0 %v862_v2, %s820_s21 }
 0x17f   : > { %v211_v12 = vpop.xlane.xlu0 %210 }
 0x180   : > { %v212_v13 = vsub.f32 %v208_v7, %v211_v12 }
 0x182   : > { %v213_v14 = vmul.f32 1.442695, %v212_v13 }
 0x183   : > { %v221_v15 = vpop.permute.xlu0 %220 }
 0x184   : > { %791 = vpow2.f32 %v213_v14  ;;  %v227_v16 = vsel %vm225_vm2, %v221_v15, 0 }
 0x185   : > { %730 = vmatpush3.bf16.msra.mxu1 %v227_v16 }
 0x186   : > { %735 = vmatprep.subr.bf16.mxu1 %v815_v0 }
 0x18e   : > { %v881_v19 = vpop.eup %791 }
 0x18f   : > { %v218_v21 = vpack.c.bf16 %v881_v19, %v881_v19 }
 0x191   : > { %732 = vmatmul.mubr.msk.bf16.vlgmr.msra.gmra.mrb[0].mxu1 %vm161_vm1, %v218_v21 }
 0x192   : > { %736 = vmatpush3.bf16.xpose.msra.mxu1 %v280_v20  ;;  %737 = vmatprep.mubr.msk.bf16.mxu1 %vm816_vm0, %v815_v0 }
 0x193   : > { %747 = vmatprep.subr.bf16.mxu1 %v815_v0 }
 0x199   : > { %738 = vmatmul.mubr.msk.bf16.vlgmr.msra.gmra.mrb[4].mxu1 %vm161_vm1, %v273_v18 }
 0x19a   : > { %748 = vmatpush3.bf16.xpose.msra.mxu1 %v391_v24  ;;  %749 = vmatprep.mubr.msk.bf16.mxu1 %vm816_vm0, %v815_v0 }
 0x19b   : > { %759 = vmatprep.subr.bf16.mxu1 %v815_v0 }
 0x1a1   : > { %750 = vmatmul.mubr.msk.bf16.vlgmr.msra.gmra.mrb[8].mxu1 %vm161_vm1, %v384_v23 }
 0x1a2   : > { %760 = vmatpush3.bf16.xpose.msra.mxu1 %v502_v26  ;;  %761 = vmatprep.mubr.msk.bf16.mxu1 %vm816_vm0, %v815_v0 }
 0x1a9   : > { %762 = vmatmul.mubr.msk.bf16.vlgmr.msra.gmra.mrb[12].mxu1 %vm161_vm1, %v495_v27 }
 0x264   : > { %v900_v28 = vpop.f32.mrb[0].mxu1 }
 0x265   : > { %v733_v29 = vpop.f32.mrb[1].mxu1 }
 0x266   : > { %v266_v30 = vpop.f32.mrb[2].mxu1 }
 0x267   : > { %v734_v31 = vpop.f32.mrb[3].mxu1 }
 0x26c   : > { %v316_v32 = vpop.f32.mrb[4].mxu1 }
 0x26d   : > { %v322_v33 = vmul.f32 0.35355338, %v316_v32  ;;  %v739_v34 = vpop.f32.mrb[5].mxu1 }
 0x26e   : > { %v319_v35 = vpop.f32.mrb[6].mxu1 }
 0x26f   : > { %v740_v36 = vpop.f32.mrb[7].mxu1  ;;  %v323_v37 = vsel %vm161_vm1, %v322_v33, -inf }
 0x270   : > { %324 = vmax.xlane.f32.xlu1 %v323_v37 }
 0x274   : > { %v427_v38 = vpop.f32.mrb[8].mxu1 }
 0x275   : > { %v433_v39 = vmul.f32 0.35355338, %v427_v38  ;;  %v751_v40 = vpop.f32.mrb[9].mxu1 }
 0x276   : > { %v430_v41 = vpop.f32.mrb[10].mxu1 }
 0x277   : > { %v752_v42 = vpop.f32.mrb[11].mxu1  ;;  %v434_v43 = vsel %vm161_vm1, %v433_v39, -inf }
 0x278   : > { %435 = vmax.xlane.f32.xlu0 %v434_v43 }
 0x27c   : > { %v538_v44 = vpop.f32.mrb[12].mxu1 }
 0x27d   : > { %v544_v45 = vmul.f32 0.35355338, %v538_v44  ;;  %v763_v46 = vpop.f32.mrb[13].mxu1 }
 0x27e   : > { %v541_v47 = vpop.f32.mrb[14].mxu1 }
 0x27f   : > { %v764_v48 = vpop.f32.mrb[15].mxu1  ;;  %v545_v49 = vsel %vm161_vm1, %v544_v45, -inf }
 0x280   : > { %546 = vmax.xlane.f32.xlu0 %v545_v49 }
 0x281   : > { %333 = vrot.lane.b32.xlu1 %v862_v2, %s821_s22 }
 0x285   : > { %555 = vrot.lane.b32.xlu1 %v862_v2, %s822_s23 }
 0x296   : > { %444 = vrot.lane.b32.xlu0 %v862_v2, %s823_s24  ;;  %v215_v2 = vsel %vm161_vm1, %v881_v19, 0.0 }
 0x2fd   : > { %v325_v50 = vpop.xlane.xlu1 %324 }
 0x2fe   : > { %v326_v51 = vsub.f32 %v322_v33, %v325_v50 }
 0x300   : > { %v327_v52 = vmul.f32 1.442695, %v326_v51 }
 0x301   : > { %v334_v53 = vpop.permute.xlu1 %333 }
 0x302   : > { %793 = vpow2.f32 %v327_v52  ;;  %v339_v54 = vsel %vm225_vm2, %v334_v53, 0 }
 0x303   : > { %742 = vmatpush3.bf16.msra.mxu0 %v339_v54 }
 0x304   : > { %753 = vmatprep.subr.bf16.mxu0 %v815_v0 }
 0x305   : > { %v436_v55 = vpop.xlane.xlu0 %435  ;;  %v556_v4 = vpop.permute.xlu1 %555 }
 0x306   : > { %v437_v56 = vsub.f32 %v433_v39, %v436_v55  ;;  %v561_v8 = vsel %vm225_vm2, %v556_v4, 0 }
 0x308   : > { %v438_v57 = vmul.f32 1.442695, %v437_v56 }
 0x30a   : > { %795 = vpow2.f32 %v438_v57 }
 0x30c   : > { %v794_v58 = vpop.eup %793 }
 0x30d   : > { %v547_v59 = vpop.xlane.xlu0 %546  ;;  %v329_v60 = vsel %vm161_vm1, %v794_v58, 0.0  ;;  %v332_v61 = vpack.c.bf16 %v794_v58, %v794_v58 }
 0x30e   : > { %v548_v62 = vsub.f32 %v544_v45, %v547_v59  ;;  %330 = vadd.xlane.f32.xlu1 %v329_v60 }
 0x30f   : > { %744 = vmatmul.mubr.msk.bf16.vlgmr.msra.gmra.mrb[4].mxu0 %vm161_vm1, %v332_v61 }
 0x310   : > { %v549_v63 = vmul.f32 1.442695, %v548_v62  ;;  %755 = vmatprep.mubr.msk.bf16.mxu0 %vm816_vm0, %v815_v0 }
 0x311   : > { %v445_v1 = vpop.permute.xlu0 %444 }
 0x312   : > { %797 = vpow2.f32 %v549_v63  ;;  %v450_v3 = vsel %vm225_vm2, %v445_v1, 0  ;;  %216 = vadd.xlane.f32.xlu1 %v215_v2 }
 0x313   : > { %754 = vmatpush3.bf16.msra.mxu0 %v450_v3 }
 0x314   : > { %v796_v5 = vpop.eup %795  ;;  %765 = vmatprep.subr.bf16.mxu0 %v815_v0 }
 0x315   : > { %v440_v6 = vsel %vm161_vm1, %v796_v5, 0.0  ;;  %v443_v7 = vpack.c.bf16 %v796_v5, %v796_v5 }
 0x316   : > { %441 = vadd.xlane.f32.xlu0 %v440_v6 }
 0x317   : > { %756 = vmatmul.mubr.msk.bf16.vlgmr.msra.gmra.mrb[8].mxu0 %vm161_vm1, %v443_v7 }
 0x318   : > { %766 = vmatpush3.bf16.msra.mxu0 %v561_v8  ;;  %767 = vmatprep.mubr.msk.bf16.mxu0 %vm816_vm0, %v815_v0 }
 0x31c   : > { %v798_v9 = vpop.eup %797 }
 0x31d   : > { %v551_v10 = vsel %vm161_vm1, %v798_v9, 0.0  ;;  %v554_v11 = vpack.c.bf16 %v798_v9, %v798_v9 }
 0x31e   : > { %552 = vadd.xlane.f32.xlu0 %v551_v10 }
 0x31f   : > { %768 = vmatmul.mubr.msk.bf16.vlgmr.msra.gmra.mrb[12].mxu0 %vm161_vm1, %v554_v11 }
 0x39b   : > { %v331_v12 = vpop.xlane.xlu1 %330 }
 0x39c   : > { %799 = vrcp.f32 %v331_v12 }
 0x39f   : > { %v217_v33 = vpop.xlane.xlu1 %216 }
 0x3a3   : > { %v442_v13 = vpop.xlane.xlu0 %441 }
 0x3a4   : > { %801 = vrcp.f32 %v442_v13 }
 0x3a6   : > { %v800_v14 = vpop.eup %799 }
 0x3ab   : > { %v553_v19 = vpop.xlane.xlu0 %552 }
 0x3ac   : > { %803 = vrcp.f32 %v553_v19 }
 0x3ad   : > { %805 = vrcp.f32 %v217_v33 }
 0x3ae   : > { %v802_v20 = vpop.eup %801 }
 0x3b6   : > { %v804_v26 = vpop.eup %803 }
 0x3b7   : > { %v806_v34 = vpop.eup %805 }
 0x3b8   : > { %v270_v37 = vmul.f32 %v806_v34, %v900_v28 }
 0x3e2   : > { %v375_v15 = vpop.f32.mrb[4].mxu0 }
 0x3e3   : > { %v382_v16 = vmul.f32 %v800_v14, %v375_v15  ;;  %v745_v17 = vpop.f32.mrb[5].mxu0 }
 0x3e4   : > { %v378_v18 = vpop.f32.mrb[6].mxu0 }
 0x3e5   : > { %606 = vrot.lane.b32.xlu0 %v382_v16, %s824_s25  ;;  %v746_v0 = vpop.f32.mrb[7].mxu0 }
 0x3ea   : > { %v486_v21 = vpop.f32.mrb[8].mxu0 }
 0x3eb   : > { %v493_v22 = vmul.f32 %v802_v20, %v486_v21  ;;  %v757_v23 = vpop.f32.mrb[9].mxu0 }
 0x3ec   : > { %v489_v24 = vpop.f32.mrb[10].mxu0 }
 0x3ed   : > { %610 = vrot.lane.b32.xlu1 %v493_v22, %s825_s26  ;;  %v758_v25 = vpop.f32.mrb[11].mxu0 }
 0x3f2   : > { %v597_v27 = vpop.f32.mrb[12].mxu0 }
 0x3f3   : > { %v604_v29 = vmul.f32 %v804_v26, %v597_v27  ;;  %v769_v30 = vpop.f32.mrb[13].mxu0 }
 0x3f4   : > { %v600_v31 = vpop.f32.mrb[14].mxu0 }
 0x3f5   : > { %614 = vrot.lane.b32.xlu1 %v604_v29, %s826_s27  ;;  %v770_v32 = vpop.f32.mrb[15].mxu0 }
 0x457   : > { %v607_v35 = vpop.permute.xlu0 %606 }
 0x458   : > { %v617_v38 = vsel %vm161_vm1, %v270_v37, %v607_v35 }
 0x45f   : > { %v611_v36 = vpop.permute.xlu1 %610 }
 0x460   : > { %v619_v39 = vsel %vm618_vm3, %v617_v38, %v611_v36 }
 0x467   : > { %v615_v40 = vpop.permute.xlu1 %614 }
 0x468   : > { %v621_v41 = vsel %vm620_vm4, %v619_v39, %v615_v40 }
 0x469   : > { %623 = vst.msk [vmem:[%s155_s30] sm:$0xff] %vm622_vm5, %v621_v41 }
 0x46a PF: > { %s12_s9 = sadd.s32 1, %s813_s9  }
 0x46b   : > { %p9_p4 = scmp.ge.s32.totalorder %s12_s9, 4  }
 0x46d   :  { %11 = sbr.rel (!%p9_p4) target bundleno = 1 (0x1), region = 61 }

// kernel: transformer_decoder_fwd.41
= control target key start
LH: loop header
LB: loop body
LE: loop exit
PB: predicated region body
PF: predicated region fallthrough
CT: control target
= control target key end

     0   :  { %s694_s15 = smov 0   ;;  %s696_s16 = smov 0   ;;  %s757_s0 = inlined_call_operand.vmem [shape: f32[16,128], index: 0, kind: input, shape index: {}]   ;;  %s758_s1 = inlined_call_operand.vmem [shape: bf16[128,128], index: 1, kind: input, shape index: {}]   ;;  %s759_s2 = inlined_call_operand.vmem [shape: f32[1,128], index: 2, kind: input, shape index: {}]   ;;  %s760_s3 = inlined_call_operand.vmem [shape: f32[16,128], index: 3, kind: input, shape index: {}]   ;;  %s761_s4 = inlined_call_operand.vmem [shape: f32[16,128], index: 4, kind: output, shape index: {}]  }
   0x1   :  { %s698_s17 = smov 0  }
   0x2 LB: > { %s33_s18 = sadd.s32 1, %s661_s16  ;;  %p565_p0 = scmp.ge.s32.totalorder %s665_s17, 1  ;;  %s665_s17 = sphi %s698_s17, %s14_s17   ;;  %s661_s16 = sphi %s696_s16, %s763_s16   ;;  %s657_s15 = sphi %s694_s15, %s762_s15  }
   0x3   : > { %p35_p1 = scmp.ge.s32.totalorder %s33_s18, 2  ;;  %p225_p2 = scmp.lt.s32.totalorder %s665_s17, 3 }
   0x5   : > { %s765_s18 = smov (%p35_p1, %s33_s18), 0  ;;  %p226_p3 = pnand %p565_p0, %p225_p2 }
   0x6   : > { %v635_v0 = vld [vmem:[%s758_s1] sm:$0xff] (!%p226_p3)   ;;  %v667_v1 = vmov (!%p226_p3), 0.0   ;;  %v636_v2 = vld [vmem:[%s758_s1 + $0x8] sm:$0xff] (!%p226_p3)   ;;  %vm668_vm0 = vmmov (!%p226_p3), 0   ;;  %v637_v3 = vld [vmem:[%s758_s1 + $0x10] sm:$0xff] (!%p226_p3)   ;;  %p273_p4 = scmp.lt.s32.totalorder (!%p226_p3), %s657_s15, 1 }
   0x7   : > { %229 = sbr.rel (%p226_p3) target bundleno = 256 (0x100), region = 36  ;;  %589 = vmatprep.subr.bf16.mxu0 (!%p226_p3), %v667_v1  ;;  %605 = vmatprep.mubr.msk.bf16.mxu0 (!%p226_p3), %vm668_vm0, %v667_v1  ;;  %v638_v4 = vld [vmem:[%s758_s1 + $0x18] sm:$0xff] (!%p226_p3)   ;;  %v639_v5 = vld [vmem:[%s758_s1 + $0x20] sm:$0xff] (!%p226_p3)   ;;  %v640_v6 = vld [vmem:[%s758_s1 + $0x28] sm:$0xff] (!%p226_p3)  }
   0x8   : > { %590 = vmatpush3.bf16.msra.mxu0 (!%p226_p3), %v635_v0  ;;  %v641_v7 = vld [vmem:[%s758_s1 + $0x30] sm:$0xff] (!%p226_p3)   ;;  %v642_v8 = vld [vmem:[%s758_s1 + $0x38] sm:$0xff] (!%p226_p3)   ;;  %v577_v12 = vld [vmem:[%s759_s2] ss:$0 sm:$0xff] (!%p226_p3) }
   0x9   : > { %591 = vmatprep.subr.bf16.mxu0 (!%p226_p3), %v667_v1 }
   0xc   : > { %592 = vmatpush3.bf16.msra.mxu0 (!%p226_p3), %v636_v2 }
   0xd   : > { %593 = vmatprep.subr.bf16.mxu0 (!%p226_p3), %v667_v1 }
   0xe   : > { %s767_s15 = smov (!%p273_p4, %s657_s15), 1 }
   0xf   : > { %s566_s5 = sshll.u32 %s767_s15, 3 }
  0x10   : > { %594 = vmatpush3.bf16.msra.mxu0 %v637_v3  ;;  %s279_s10 = scalar_lea.vmem %s757_s0, %s566_s5  ;;  %s298_s15 = scalar_lea.vmem %s760_s3, %s566_s5 }
  0x11   : > { %595 = vmatprep.subr.bf16.mxu0 %v667_v1  ;;  %v313_v9 = vld [vmem:[%s279_s10] sm:$0xff]  ;;  %s305_s23 = scalar_lea.vmem %s761_s4, %s566_s5 }
  0x12   : > { %v314_v10 = vpack.c.bf16 %v313_v9, %v313_v9  ;;  %v433_v14 = vld [vmem:[%s298_s15] sm:$0xff] }
  0x14   : > { %596 = vmatpush3.bf16.msra.mxu0 %v638_v4 }
  0x15   : > { %597 = vmatprep.subr.bf16.mxu0 %v667_v1 }
  0x18   : > { %598 = vmatpush3.bf16.msra.mxu0 %v639_v5 }
  0x19   : > { %599 = vmatprep.subr.bf16.mxu0 %v667_v1 }
  0x1c   : > { %600 = vmatpush3.bf16.msra.mxu0 %v640_v6 }
  0x1d   : > { %601 = vmatprep.subr.bf16.mxu0 %v667_v1 }
  0x20   : > { %602 = vmatpush3.bf16.msra.mxu0 %v641_v7 }
  0x21   : > { %603 = vmatprep.subr.bf16.mxu0 %v667_v1 }
  0x24   : > { %604 = vmatpush3.bf16.msra.mxu0 %v642_v8 }
  0x27   : > { %606 = vmatmul.mubr.bf16.vlgmr.msra.gmra.mrb[0].mxu0 %v314_v10 }
  0xfa   : > { %v413_v11 = vpop.f32.mrb[0].mxu0 }
  0xfb   : > { %v607_v13 = vpop.f32.mrb[1].mxu0  ;;  %v432_v16 = vadd.f32 %v577_v12, %v413_v11 }
  0xfc   : > { %v416_v15 = vpop.f32.mrb[2].mxu0 }
  0xfd   : > { %v608_v17 = vpop.f32.mrb[3].mxu0  ;;  %v434_v18 = vadd.f32 %v433_v14, %v432_v16 }
  0xff   : > { %435 = vst [vmem:[%s305_s23] sm:$0xff] %v434_v18 }
 0x100 PF: > { %s14_s17 = sadd.s32 1, %s665_s17   ;;  %s762_s15 = smov %s661_s16 }
 0x101   : > { %p11_p5 = scmp.ge.s32.totalorder %s14_s17, 4   ;;  %s763_s16 = smov %s765_s18 }
 0x103   :  { %13 = sbr.rel (!%p11_p5) target bundleno = 2 (0x2), region = 83 }

</bundles_post_ra>
